<compile_context>
chip_gen: v7x
topology: tpu7x:2x2x1
jax: 0.10.0
libtpu: 0.0.40
codegen_flags: <defaults>
</compile_context>

<pallas_src>
import functools

import jax
import jax.numpy as jnp
from jax.experimental import pallas as pl
from jax.experimental.pallas import tpu as pltpu


def _round_up(x, m):
    return ((x + m - 1) // m) * m


def _vq_kernel(x_ref, wt_ref, w_ref, wsqh_ref, cw_ref, part_ref, *,
               n_valid, tile_n, has_tail, bf16_distances):
    """One N-tile: distances -> argmin -> one-hot -> codeword -> loss partials."""
    i = pl.program_id(0)

    x = x_ref[...].astype(jnp.float32)            # (tn, D)  in-kernel cast (VPU slot)
    wt = wt_ref[...]                              # (D, Kp)  pre-transposed codebook
    w = w_ref[...]                                # (Kp, D)  codebook (zero pad rows)
    wsqh = wsqh_ref[...]                          # (1, Kp)  0.5*||e||^2 (1e30 on pads)

    # argmin_k ||x - e_k||^2 == argmin_k (0.5*||e_k||^2 - x.e_k): the per-row
    # ||x||^2 constant and the global scale are argmin-invariant.
    if bf16_distances:
        xw = jnp.dot(x.astype(jnp.bfloat16), wt.astype(jnp.bfloat16),
                     preferred_element_type=jnp.float32)                 # (tn, Kp)
    else:
        xw = jnp.dot(x, wt, preferred_element_type=jnp.float32)          # (tn, Kp) MXU
    dist = wsqh - xw                                                     # (tn, Kp) VPU

    idx = jnp.argmin(dist, axis=1, keepdims=True)                        # (tn, 1)

    # one-hot "latent" and codeword = latent @ W (matches PyTorch scatter+matmul)
    one_hot = (jax.lax.broadcasted_iota(jnp.int32, dist.shape, 1)
               == idx).astype(jnp.float32)                               # (tn, Kp)
    codeword = jnp.dot(one_hot, w, preferred_element_type=jnp.float32)   # (tn, D)

    cw_ref[...] = codeword.astype(cw_ref.dtype)

    # Per-lane partial sums of the commitment squared error (final reduce + the
    # beta/(N*D) scaling happen outside the kernel).
    err = (codeword - x) ** 2                                            # (tn, D)
    part_ref[...] = jnp.sum(err, axis=0, keepdims=True)[None]            # (1, 1, D)

    if has_tail:
        # Only the last tile overlaps the ragged tail.  Pallas clipped the
        # block read/write there; the undefined tail rows only need to be kept
        # out of the loss, so redo just that tile's partial with a row mask.
        @pl.when(i == pl.num_programs(0) - 1)
        def _():
            row = i * tile_n + jax.lax.broadcasted_iota(
                jnp.int32, (err.shape[0], 1), 0)
            masked = jnp.where(row < n_valid, err, 0.0)
            part_ref[...] = jnp.sum(masked, axis=0, keepdims=True)[None]


def vector_quantizer_forward(inputs, embedding_weight, *, beta,
                             tile_n=4096, vmem_budget_bytes=32 * 1024 * 1024,
                             bf16_distances=False):
    """Eval-mode VectorQuantizer.forward.

    inputs:            (N, D)  (N = B*H*W, flattened outside; native dtype)
    embedding_weight:  (K, D)
    returns: (loss scalar f32, codeword (N, D) in inputs.dtype)
    """
    n, d = inputs.shape
    k, d2 = embedding_weight.shape
    assert d == d2

    # --- codebook prep (once, outside the grid) ------------------------------
    kp = _round_up(k, 128)                         # lane-dense K for dist/one-hot
    w_f32 = embedding_weight.astype(jnp.float32)
    w_pad = jnp.pad(w_f32, ((0, kp - k), (0, 0)))  # (Kp, D), zero pad rows
    w_t = jnp.transpose(w_pad)                     # (D, Kp), transposed once here
    w_sq_half = 0.5 * jnp.sum(w_f32 * w_f32, axis=1)
    w_sq_half = jnp.pad(w_sq_half, (0, kp - k),
                        constant_values=1e30).reshape(1, kp)

    # --- N tile from a VMEM budget -------------------------------------------
    io_bytes = jnp.dtype(inputs.dtype).itemsize
    per_row = (4 * io_bytes * d        # double-buffered x-in + codeword-out tiles
               + 4 * 3 * kp            # xw/dist + one_hot (+ slack), f32
               + 4 * 3 * d)            # x_f32, codeword_f32, err, f32
    resident = 2 * 4 * (2 * kp * d + kp)   # double-buffered w, w_t, 0.5*||e||^2
    tn = max(8, ((max(vmem_budget_bytes - resident, per_row) // per_row) // 8) * 8)
    tn = min(tn, max(8, _round_up(tile_n, 8)), _round_up(n, 8))
    grid = pl.cdiv(n, tn)
    has_tail = (grid * tn != n)

    kernel = functools.partial(
        _vq_kernel, n_valid=n, tile_n=tn, has_tail=has_tail,
        bf16_distances=bf16_distances)

    codeword, partials = pl.pallas_call(
        kernel,
        out_shape=(
            jax.ShapeDtypeStruct((n, d), inputs.dtype),        # unpadded N
            jax.ShapeDtypeStruct((grid, 1, d), jnp.float32),   # per-tile loss partials
        ),
        grid_spec=pltpu.PrefetchScalarGridSpec(
            num_scalar_prefetch=0,
            grid=(grid,),
            in_specs=[
                pl.BlockSpec((tn, d), lambda i: (i, 0)),       # inputs tile (native dtype)
                pl.BlockSpec((d, kp), lambda i: (0, 0)),       # codebook^T (resident)
                pl.BlockSpec((kp, d), lambda i: (0, 0)),       # codebook   (resident)
                pl.BlockSpec((1, kp), lambda i: (0, 0)),       # 0.5*||e||^2 (resident)
            ],
            out_specs=[
                pl.BlockSpec((tn, d), lambda i: (i, 0)),       # codeword tile
                pl.BlockSpec((1, 1, d), lambda i: (i, 0, 0)),  # loss partials
            ],
        ),
        compiler_params=pltpu.CompilerParams(
            dimension_semantics=("parallel",),                 # megacore-shardable
            vmem_limit_bytes=48 * 1024 * 1024,                 # > v5e/v7x scoped defaults
        ),
    )(inputs, w_t, w_pad, w_sq_half)

    # tiny final reduction + scaling in plain JAX (keeps the grid axis parallel)
    loss = (beta / float(n * d)) * jnp.sum(partials)
    return loss, codeword


def _reference(inputs, weight, beta):
    dist = (jnp.sum(inputs ** 2, axis=1, keepdims=True)
            + jnp.sum(weight ** 2, axis=1)
            - 2.0 * inputs @ weight.T)
    idx = jnp.argmin(dist, axis=1)
    codeword = weight[idx]
    loss = beta * jnp.mean((codeword - inputs) ** 2)
    return loss, codeword


if __name__ == "__main__":
    # Module hyper-params (small, consistent with the PyTorch __init__ shapes)
    num_embeddings = 64   # K
    embedding_dim = 32    # D
    beta = 0.25

    key = jax.random.PRNGKey(0)
    k_w, k_x1, k_x2 = jax.random.split(key, 3)

    # embedding.weight.data.uniform_(-1/K, 1/K)
    embedding_weight = jax.random.uniform(
        k_w, (num_embeddings, embedding_dim), dtype=jnp.float32,
        minval=-1.0 / num_embeddings, maxval=1.0 / num_embeddings,
    )

    # Synthetic "encoder output", already flattened to [N, D]
    # (N = B*H*W = 2*16*16 = 512 from an NCHW [2, 32, 16, 16] feature map).
    batch, height, width = 2, 16, 16
    n1 = batch * height * width
    x1 = jax.random.normal(k_x1, (n1, embedding_dim), dtype=jnp.float32)

    # 1) default VMEM-budgeted tile (single tile here)
    loss1, cw1 = vector_quantizer_forward(x1, embedding_weight, beta=beta)
    jax.block_until_ready((loss1, cw1))
    rl1, rc1 = _reference(x1, embedding_weight, beta)
    assert jnp.allclose(loss1, rl1, rtol=1e-5, atol=1e-6), (loss1, rl1)
    assert jnp.allclose(cw1, rc1, rtol=1e-5, atol=1e-6)

    # 2) multi-tile grid (parallel axis + per-tile partials reduce), no tail
    loss1b, cw1b = vector_quantizer_forward(x1, embedding_weight, beta=beta,
                                            tile_n=64)
    jax.block_until_ready((loss1b, cw1b))
    assert jnp.allclose(loss1b, rl1, rtol=1e-5, atol=1e-6), (loss1b, rl1)
    assert jnp.allclose(cw1b, rc1, rtol=1e-5, atol=1e-6)

    # 3) ragged tail: N not a multiple of the tile -> clipped last block + mask
    n2 = 200
    x2 = jax.random.normal(k_x2, (n2, embedding_dim), dtype=jnp.float32)
    loss2, cw2 = vector_quantizer_forward(x2, embedding_weight, beta=beta,
                                          tile_n=128)
    jax.block_until_ready((loss2, cw2))
    rl2, rc2 = _reference(x2, embedding_weight, beta)
    assert jnp.allclose(loss2, rl2, rtol=1e-5, atol=1e-6), (loss2, rl2)
    assert jnp.allclose(cw2, rc2, rtol=1e-5, atol=1e-6)

    print("KERNEL_OK")
</pallas_src>

<mosaic_0001>
module attributes {stable_mosaic.version = 11 : i64} {
  func.func @_vq_kernel(%arg0: i32, %arg1: memref<512x32xf32, #tpu.memory_space<vmem>>, %arg2: memref<32x128xf32, #tpu.memory_space<vmem>>, %arg3: memref<128x32xf32, #tpu.memory_space<vmem>>, %arg4: memref<1x128xf32, #tpu.memory_space<vmem>>, %arg5: memref<512x32xf32, #tpu.memory_space<vmem>>, %arg6: memref<1x1x32xf32, #tpu.memory_space<vmem>>) attributes {dimension_semantics = [#tpu.dimension_semantics<parallel>], iteration_bounds = array<i64: 1>, scalar_prefetch = 0 : i64, scratch_operands = 0 : i64, tpu.core_type = #tpu.core_type<tc>, window_params = [{transform_indices = @transform_0, window_bounds = array<i64: 512, 32>}, {pipeline_mode = #tpu.pipeline_mode<synchronous>, transform_indices = @transform_1, window_bounds = array<i64: 32, 128>}, {pipeline_mode = #tpu.pipeline_mode<synchronous>, transform_indices = @transform_2, window_bounds = array<i64: 128, 32>}, {pipeline_mode = #tpu.pipeline_mode<synchronous>, transform_indices = @transform_3, window_bounds = array<i64: 1, 128>}, {transform_indices = @transform_4, window_bounds = array<i64: 512, 32>}, {transform_indices = @transform_5, window_bounds = array<i64: 1, 1, 32>}]} {
    %c0 = arith.constant 0 : index
    %c0_0 = arith.constant 0 : index
    %0 = vector.load %arg1[%c0, %c0_0] : memref<512x32xf32, #tpu.memory_space<vmem>>, vector<512x32xf32>
    %c0_1 = arith.constant 0 : index
    %c0_2 = arith.constant 0 : index
    %1 = vector.load %arg2[%c0_1, %c0_2] : memref<32x128xf32, #tpu.memory_space<vmem>>, vector<32x128xf32>
    %c0_3 = arith.constant 0 : index
    %c0_4 = arith.constant 0 : index
    %2 = vector.load %arg3[%c0_3, %c0_4] : memref<128x32xf32, #tpu.memory_space<vmem>>, vector<128x32xf32>
    %c0_5 = arith.constant 0 : index
    %c0_6 = arith.constant 0 : index
    %3 = vector.load %arg4[%c0_5, %c0_6] : memref<1x128xf32, #tpu.memory_space<vmem>>, vector<1x128xf32>
    %cst = arith.constant dense<0.000000e+00> : vector<512x128xf32>
    %4 = tpu.matmul %0, %1, %cst {dimension_numbers = #tpu.dot_dimension_numbers<[1], [0], [0], [1], [0, 0, 1, 1], [], []>} : vector<512x32xf32>, vector<32x128xf32>, vector<512x128xf32> -> vector<512x128xf32>
    %5 = vector.broadcast %3 : vector<1x128xf32> to vector<512x128xf32>
    %6 = arith.subf %5, %4 : vector<512x128xf32>
    %7 = tpu.reduce_index %6 {axis = 1 : i32, kind = #tpu.reduction_kind<arg_min>} : vector<512x128xf32> -> vector<512xi32>
    %8 = vector.shape_cast %7 : vector<512xi32> to vector<512x1xi32>
    %9 = tpu.iota {dimensions = array<i32: 1>} : vector<512x128xi32>
    %10 = vector.broadcast %8 : vector<512x1xi32> to vector<512x128xi32>
    %11 = arith.cmpi eq, %9, %10 : vector<512x128xi32>
    %12 = arith.extui %11 : vector<512x128xi1> to vector<512x128xi32>
    %13 = arith.sitofp %12 : vector<512x128xi32> to vector<512x128xf32>
    %cst_7 = arith.constant dense<0.000000e+00> : vector<512x32xf32>
    %14 = tpu.matmul %13, %2, %cst_7 {dimension_numbers = #tpu.dot_dimension_numbers<[1], [0], [0], [1], [0, 0, 1, 1], [], []>} : vector<512x128xf32>, vector<128x32xf32>, vector<512x32xf32> -> vector<512x32xf32>
    %c0_8 = arith.constant 0 : index
    %c0_9 = arith.constant 0 : index
    %15 = vector.load %arg5[%c0_8, %c0_9] : memref<512x32xf32, #tpu.memory_space<vmem>>, vector<512x32xf32>
    tpu.vector_store %arg5[%c0_8, %c0_9], %14 {strides = array<i32>} : memref<512x32xf32, #tpu.memory_space<vmem>>, vector<512x32xf32>,
    %16 = arith.subf %14, %0 : vector<512x32xf32>
    %17 = arith.mulf %16, %16 : vector<512x32xf32>
    %cst_10 = arith.constant dense<0.000000e+00> : vector<32xf32>
    %18 = vector.multi_reduction <add>, %17, %cst_10 [0] : vector<512x32xf32> to vector<32xf32>
    %19 = vector.shape_cast %18 : vector<32xf32> to vector<1x32xf32>
    %20 = vector.shape_cast %19 : vector<1x32xf32> to vector<1x1x32xf32>
    %c0_11 = arith.constant 0 : index
    %c0_12 = arith.constant 0 : index
    %c0_13 = arith.constant 0 : index
    %21 = vector.load %arg6[%c0_11, %c0_12, %c0_13] : memref<1x1x32xf32, #tpu.memory_space<vmem>>, vector<1x1x32xf32>
    tpu.vector_store %arg6[%c0_11, %c0_12, %c0_13], %20 {strides = array<i32>} : memref<1x1x32xf32, #tpu.memory_space<vmem>>, vector<1x1x32xf32>,
    return
  }
  func.func @transform_0(%arg0: i32) -> (i32, i32) {
    %c0_i32 = arith.constant 0 : i32
    %c0_i32_0 = arith.constant 0 : i32
    return %arg0, %c0_i32 : i32, i32
  }
  func.func @transform_1(%arg0: i32) -> (i32, i32) {
    %c0_i32 = arith.constant 0 : i32
    %c0_i32_0 = arith.constant 0 : i32
    %c0_i32_1 = arith.constant 0 : i32
    return %c0_i32, %c0_i32_0 : i32, i32
  }
  func.func @transform_2(%arg0: i32) -> (i32, i32) {
    %c0_i32 = arith.constant 0 : i32
    %c0_i32_0 = arith.constant 0 : i32
    %c0_i32_1 = arith.constant 0 : i32
    return %c0_i32, %c0_i32_0 : i32, i32
  }
  func.func @transform_3(%arg0: i32) -> (i32, i32) {
    %c0_i32 = arith.constant 0 : i32
    %c0_i32_0 = arith.constant 0 : i32
    %c0_i32_1 = arith.constant 0 : i32
    return %c0_i32, %c0_i32_0 : i32, i32
  }
  func.func @transform_4(%arg0: i32) -> (i32, i32) {
    %c0_i32 = arith.constant 0 : i32
    %c0_i32_0 = arith.constant 0 : i32
    return %arg0, %c0_i32 : i32, i32
  }
  func.func @transform_5(%arg0: i32) -> (i32, i32, i32) {
    %c0_i32 = arith.constant 0 : i32
    %c0_i32_0 = arith.constant 0 : i32
    %c0_i32_1 = arith.constant 0 : i32
    return %arg0, %c0_i32, %c0_i32_0 : i32, i32, i32
  }
}

</mosaic_0001>

<bundles_post_ra>
// kernel: tpu_custom_call.1
= control target key start
LH: loop header
LB: loop body
LE: loop exit
PB: predicated region body
PF: predicated region fallthrough
CT: control target
= control target key end

     0   :  { %vm105_vm0 = vcmask 261120   ;;  %s3595_s0 = inlined_call_operand.vmem [shape: f32[512,32], index: 0, kind: input, shape index: {}]   ;;  %s3596_s1 = inlined_call_operand.vmem [shape: f32[32,128], index: 1, kind: input, shape index: {}]   ;;  %s3597_s2 = inlined_call_operand.vmem [shape: f32[128,32], index: 2, kind: input, shape index: {}]   ;;  %s3598_s3 = inlined_call_operand.vmem [shape: f32[1,128], index: 3, kind: input, shape index: {}]   ;;  %s3599_s4 = inlined_call_operand.vmem [shape: f32[512,32], index: 4, kind: output, shape index: {0}]   ;;  %s3600_s5 = inlined_call_operand.hbm [shape: f32[1,1,32], index: 5, kind: output, shape index: {1}]  }
   0x1   :  { %v84_v0 = vld [vmem:[%s3596_s1] sm:$0xff]  ;;  %v85_v1 = vld [vmem:[%s3596_s1 + $0x8] sm:$0xff]  ;;  %v86_v2 = vld [vmem:[%s3596_s1 + $0x10] sm:$0xff] }
   0x2   :  { %v2378_v3 = vpack.c.bf16 %v85_v1, %v84_v0  ;;  %v87_v4 = vld [vmem:[%s3596_s1 + $0x18] sm:$0xff]  ;;  %v20_v5 = vld [vmem:[%s3595_s0] sm:$0xff]  ;;  %v21_v7 = vld [vmem:[%s3595_s0 + $0x8] sm:$0xff] }
   0x3   :  { %v2382_v6 = vpack.c.bf16 %v87_v4, %v86_v2  ;;  %2154 = vmatprep.mubr.msk.f32.mxu0 %vm105_vm0, %v20_v5  ;;  %v22_v8 = vld [vmem:[%s3595_s0 + $0x10] sm:$0xff]  ;;  %v23_v9 = vld [vmem:[%s3595_s0 + $0x18] sm:$0xff]  ;;  %v24_v10 = vld [vmem:[%s3595_s0 + $0x20] sm:$0xff] }
   0x4   :  { %2379 = vmatprep.subr.bf16.mxu0 %v2378_v3  ;;  %v25_v11 = vld [vmem:[%s3595_s0 + $0x28] sm:$0xff]  ;;  %v26_v12 = vld [vmem:[%s3595_s0 + $0x30] sm:$0xff]  ;;  %v27_v13 = vld [vmem:[%s3595_s0 + $0x38] sm:$0xff] }
   0x5   :  { %2381 = vmatpush3.bf16.msra.mxu0 %v2378_v3  ;;  %v28_v14 = vld [vmem:[%s3595_s0 + $0x40] sm:$0xff] }
   0x6   :  { %2383 = vmatprep.subr.bf16.mxu0 %v2382_v6 }
   0x9   :  { %2385 = vmatpush3.bf16.msra.mxu0 %v2382_v6 }
   0xc   :  { %2155 = vmatmul.mubr.msk.f32.vlgmr.msra.gmra.mrb[0].mxu0 %vm105_vm0, %v21_v7 }
   0xd   :  { %2157 = vmatprep.mubr.msk.f32.mxu0 %vm105_vm0, %v22_v8 }
  0x10   :  { %2158 = vmatmul.mubr.msk.f32.gmra.mrb[2].mxu0 %vm105_vm0, %v23_v9 }
  0x11   :  { %2160 = vmatprep.mubr.msk.f32.mxu0 %vm105_vm0, %v24_v10 }
  0x14   :  { %2161 = vmatmul.mubr.msk.f32.gmra.mrb[4].mxu0 %vm105_vm0, %v25_v11 }
  0x15   :  { %2163 = vmatprep.mubr.msk.f32.mxu0 %vm105_vm0, %v26_v12 }
  0x18   :  { %2164 = vmatmul.mubr.msk.f32.gmra.mrb[6].mxu0 %vm105_vm0, %v27_v13 }
  0x19   :  { %11 = vsyncpa [#allocation3], 0  ;;  %2166 = vmatprep.mubr.msk.f32.mxu0 %vm105_vm0, %v28_v14  ;;  %v29_v15 = vld [vmem:[%s3595_s0 + $0x48] sm:$0xff]  ;;  %v30_v16 = vld [vmem:[%s3595_s0 + $0x50] sm:$0xff] }
  0x1a   :  { %v31_v17 = vld [vmem:[%s3595_s0 + $0x58] sm:$0xff]  ;;  %v32_v18 = vld [vmem:[%s3595_s0 + $0x60] sm:$0xff]  ;;  %v33_v19 = vld [vmem:[%s3595_s0 + $0x68] sm:$0xff] }
  0x1b   :  { %v34_v20 = vld [vmem:[%s3595_s0 + $0x70] sm:$0xff]  ;;  %v35_v21 = vld [vmem:[%s3595_s0 + $0x78] sm:$0xff]  ;;  %v36_v22 = vld [vmem:[%s3595_s0 + $0x80] sm:$0xff] }
  0x1c   :  { %2167 = vmatmul.mubr.msk.f32.gmra.mrb[8].mxu0 %vm105_vm0, %v29_v15  ;;  %v37_v23 = vld [vmem:[%s3595_s0 + $0x88] sm:$0xff]  ;;  %v38_v24 = vld [vmem:[%s3595_s0 + $0x90] sm:$0xff]  ;;  %v39_v25 = vld [vmem:[%s3595_s0 + $0x98] sm:$0xff] }
  0x1d   :  { %2169 = vmatprep.mubr.msk.f32.mxu0 %vm105_vm0, %v30_v16  ;;  %v40_v26 = vld [vmem:[%s3595_s0 + $0xa0] sm:$0xff]  ;;  %v41_v27 = vld [vmem:[%s3595_s0 + $0xa8] sm:$0xff]  ;;  %v42_v28 = vld [vmem:[%s3595_s0 + $0xb0] sm:$0xff] }
  0x1e   :  { %v43_v29 = vld [vmem:[%s3595_s0 + $0xb8] sm:$0xff]  ;;  %v44_v30 = vld [vmem:[%s3595_s0 + $0xc0] sm:$0xff]  ;;  %v45_v31 = vld [vmem:[%s3595_s0 + $0xc8] sm:$0xff] }
  0x1f   :  { %v46_v32 = vld [vmem:[%s3595_s0 + $0xd0] sm:$0xff]  ;;  %v47_v33 = vld [vmem:[%s3595_s0 + $0xd8] sm:$0xff]  ;;  %v48_v34 = vld [vmem:[%s3595_s0 + $0xe0] sm:$0xff] }
  0x20   :  { %2170 = vmatmul.mubr.msk.f32.gmra.mrb[10].mxu0 %vm105_vm0, %v31_v17  ;;  %v49_v35 = vld [vmem:[%s3595_s0 + $0xe8] sm:$0xff]  ;;  %v50_v36 = vld [vmem:[%s3595_s0 + $0xf0] sm:$0xff]  ;;  %v51_v37 = vld [vmem:[%s3595_s0 + $0xf8] sm:$0xff] }
  0x21   :  { %2172 = vmatprep.mubr.msk.f32.mxu0 %vm105_vm0, %v32_v18  ;;  %v52_v38 = vld [vmem:[%s3595_s0 + $0x100] sm:$0xff]  ;;  %v53_v39 = vld [vmem:[%s3595_s0 + $0x108] sm:$0xff]  ;;  %v54_v40 = vld [vmem:[%s3595_s0 + $0x110] sm:$0xff] }
  0x22   :  { %v55_v41 = vld [vmem:[%s3595_s0 + $0x118] sm:$0xff]  ;;  %v56_v42 = vld [vmem:[%s3595_s0 + $0x120] sm:$0xff]  ;;  %v57_v43 = vld [vmem:[%s3595_s0 + $0x128] sm:$0xff] }
  0x23   :  { %v58_v44 = vld [vmem:[%s3595_s0 + $0x130] sm:$0xff]  ;;  %v59_v45 = vld [vmem:[%s3595_s0 + $0x138] sm:$0xff]  ;;  %v60_v46 = vld [vmem:[%s3595_s0 + $0x140] sm:$0xff] }
  0x24   :  { %2173 = vmatmul.mubr.msk.f32.gmra.mrb[12].mxu0 %vm105_vm0, %v33_v19  ;;  %v61_v47 = vld [vmem:[%s3595_s0 + $0x148] sm:$0xff]  ;;  %v62_v48 = vld [vmem:[%s3595_s0 + $0x150] sm:$0xff]  ;;  %v63_v49 = vld [vmem:[%s3595_s0 + $0x158] sm:$0xff] }
  0x25   :  { %2175 = vmatprep.mubr.msk.f32.mxu0 %vm105_vm0, %v34_v20  ;;  %v64_v50 = vld [vmem:[%s3595_s0 + $0x160] sm:$0xff]  ;;  %v65_v51 = vld [vmem:[%s3595_s0 + $0x168] sm:$0xff]  ;;  %v66_v52 = vld [vmem:[%s3595_s0 + $0x170] sm:$0xff] }
  0x26   :  { %v67_v53 = vld [vmem:[%s3595_s0 + $0x178] sm:$0xff]  ;;  %v68_v54 = vld [vmem:[%s3595_s0 + $0x180] sm:$0xff]  ;;  %v69_v55 = vld [vmem:[%s3595_s0 + $0x188] sm:$0xff] }
  0x27   :  { %v70_v56 = vld [vmem:[%s3595_s0 + $0x190] sm:$0xff]  ;;  %v71_v57 = vld [vmem:[%s3595_s0 + $0x198] sm:$0xff]  ;;  %v72_v58 = vld [vmem:[%s3595_s0 + $0x1a0] sm:$0xff] }
  0x28   :  { %2176 = vmatmul.mubr.msk.f32.gmra.mrb[14].mxu0 %vm105_vm0, %v35_v21  ;;  %v73_v59 = vld [vmem:[%s3595_s0 + $0x1a8] sm:$0xff]  ;;  %v74_v60 = vld [vmem:[%s3595_s0 + $0x1b0] sm:$0xff]  ;;  %v88_v61 = vld [vmem:[%s3597_s2] sm:$0xff] }
  0x29   :  { %2178 = vmatprep.mubr.msk.f32.mxu0 %vm105_vm0, %v36_v22  ;;  %v89_v62 = vld [vmem:[%s3597_s2 + $0x8] sm:$0xff]  ;;  %v75_v0 = vld [vmem:[%s3595_s0 + $0x1b8] sm:$0xff]  ;;  %v76_v1 = vld [vmem:[%s3595_s0 + $0x1c0] sm:$0xff] }
  0x2a   :  { %v2386_v63 = vpack.c.bf16 %v89_v62, %v88_v61  ;;  %v77_v2 = vld [vmem:[%s3595_s0 + $0x1c8] sm:$0xff]  ;;  %v78_v3 = vld [vmem:[%s3595_s0 + $0x1d0] sm:$0xff]  ;;  %v79_v4 = vld [vmem:[%s3595_s0 + $0x1d8] sm:$0xff] }
  0x2b   :  { %v80_v5 = vld [vmem:[%s3595_s0 + $0x1e0] sm:$0xff]  ;;  %v81_v6 = vld [vmem:[%s3595_s0 + $0x1e8] sm:$0xff]  ;;  %v82_v7 = vld [vmem:[%s3595_s0 + $0x1f0] sm:$0xff] }
  0x2c   :  { %2179 = vmatmul.mubr.msk.f32.gmra.mrb[16].mxu0 %vm105_vm0, %v37_v23  ;;  %2387 = vmatprep.subr.bf16.mxu0 %v2386_v63  ;;  %v90_v8 = vld [vmem:[%s3597_s2 + $0x10] sm:$0xff]  ;;  %v91_v9 = vld [vmem:[%s3597_s2 + $0x18] sm:$0xff]  ;;  %v92_v12 = vld [vmem:[%s3597_s2 + $0x20] sm:$0xff] }
  0x2d   :  { %2181 = vmatprep.mubr.msk.f32.mxu0 %vm105_vm0, %v38_v24  ;;  %2418 = vmatprep.subr.bf16.mxu1 %v2386_v63  ;;  %v2390_v10 = vpack.c.bf16 %v91_v9, %v90_v8  ;;  %v83_v11 = vld [vmem:[%s3595_s0 + $0x1f8] sm:$0xff]  ;;  %v93_v13 = vld [vmem:[%s3597_s2 + $0x28] sm:$0xff]  ;;  %v94_v15 = vld [vmem:[%s3597_s2 + $0x30] sm:$0xff] }
  0x2e   :  { %2389 = vmatpush3.bf16.msra.mxu0 %v2386_v63  ;;  %2426 = vmatpush3.bf16.msra.mxu1 %v2386_v63  ;;  %v2394_v14 = vpack.c.bf16 %v93_v13, %v92_v12  ;;  %v95_v16 = vld [vmem:[%s3597_s2 + $0x38] sm:$0xff]  ;;  %v96_v18 = vld [vmem:[%s3597_s2 + $0x40] sm:$0xff]  ;;  %v97_v19 = vld [vmem:[%s3597_s2 + $0x48] sm:$0xff] }
  0x2f   :  { %2391 = vmatprep.subr.bf16.mxu0 %v2390_v10  ;;  %2419 = vmatprep.subr.bf16.mxu1 %v2390_v10  ;;  %v2398_v17 = vpack.c.bf16 %v95_v16, %v94_v15  ;;  %v2402_v20 = vpack.c.bf16 %v97_v19, %v96_v18  ;;  %v98_v21 = vld [vmem:[%s3597_s2 + $0x50] sm:$0xff]  ;;  %v99_v22 = vld [vmem:[%s3597_s2 + $0x58] sm:$0xff]  ;;  %v100_v24 = vld [vmem:[%s3597_s2 + $0x60] sm:$0xff] }
  0x30   :  { %2182 = vmatmul.mubr.msk.f32.gmra.mrb[18].mxu0 %vm105_vm0, %v39_v25  ;;  %v2406_v23 = vpack.c.bf16 %v99_v22, %v98_v21  ;;  %v101_v25 = vld [vmem:[%s3597_s2 + $0x68] sm:$0xff] }
  0x31   :  { %2184 = vmatprep.mubr.msk.f32.mxu0 %vm105_vm0, %v40_v26  ;;  %v2410_v26 = vpack.c.bf16 %v101_v25, %v100_v24 }
  0x32   :  { %2393 = vmatpush3.bf16.msra.mxu0 %v2390_v10  ;;  %2427 = vmatpush3.bf16.msra.mxu1 %v2390_v10 }
  0x33   :  { %2395 = vmatprep.subr.bf16.mxu0 %v2394_v14  ;;  %2420 = vmatprep.subr.bf16.mxu1 %v2394_v14 }
  0x34   :  { %2185 = vmatmul.mubr.msk.f32.gmra.mrb[20].mxu0 %vm105_vm0, %v41_v27  ;;  %v2869_v27 = vld [vmem:[%s3598_s3] ss:$0 sm:$0xff] }
  0x35   :  { %2187 = vmatprep.mubr.msk.f32.mxu0 %vm105_vm0, %v42_v28 }
  0x36   :  { %2397 = vmatpush3.bf16.msra.mxu0 %v2394_v14  ;;  %2428 = vmatpush3.bf16.msra.mxu1 %v2394_v14 }
  0x37   :  { %2399 = vmatprep.subr.bf16.mxu0 %v2398_v17  ;;  %2421 = vmatprep.subr.bf16.mxu1 %v2398_v17 }
  0x38   :  { %2188 = vmatmul.mubr.msk.f32.gmra.mrb[22].mxu0 %vm105_vm0, %v43_v29 }
  0x39   :  { %2190 = vmatprep.mubr.msk.f32.mxu0 %vm105_vm0, %v44_v30 }
  0x3a   :  { %2401 = vmatpush3.bf16.msra.mxu0 %v2398_v17  ;;  %2429 = vmatpush3.bf16.msra.mxu1 %v2398_v17 }
  0x3b   :  { %2403 = vmatprep.subr.bf16.mxu0 %v2402_v20  ;;  %2422 = vmatprep.subr.bf16.mxu1 %v2402_v20 }
  0x3c   :  { %2191 = vmatmul.mubr.msk.f32.gmra.mrb[24].mxu0 %vm105_vm0, %v45_v31 }
  0x3d   :  { %2193 = vmatprep.mubr.msk.f32.mxu0 %vm105_vm0, %v46_v32  ;;  %v102_v32 = vld [vmem:[%s3597_s2 + $0x70] sm:$0xff] }
  0x3e   :  { %2405 = vmatpush3.bf16.msra.mxu0 %v2402_v20  ;;  %2430 = vmatpush3.bf16.msra.mxu1 %v2402_v20 }
  0x3f   :  { %2407 = vmatprep.subr.bf16.mxu0 %v2406_v23  ;;  %2423 = vmatprep.subr.bf16.mxu1 %v2406_v23 }
  0x40   :  { %2194 = vmatmul.mubr.msk.f32.gmra.mrb[26].mxu0 %vm105_vm0, %v47_v33  ;;  %v103_v33 = vld [vmem:[%s3597_s2 + $0x78] sm:$0xff] }
  0x41   :  { %2196 = vmatprep.mubr.msk.f32.mxu0 %vm105_vm0, %v48_v34 }
  0x42   :  { %2409 = vmatpush3.bf16.msra.mxu0 %v2406_v23  ;;  %2431 = vmatpush3.bf16.msra.mxu1 %v2406_v23 }
  0x43   :  { %2411 = vmatprep.subr.bf16.mxu0 %v2410_v26  ;;  %2424 = vmatprep.subr.bf16.mxu1 %v2410_v26 }
  0x44   :  { %2197 = vmatmul.mubr.msk.f32.gmra.mrb[28].mxu0 %vm105_vm0, %v49_v35  ;;  %v2414_v35 = vpack.c.bf16 %v103_v33, %v102_v32 }
  0x45   :  { %2199 = vmatprep.mubr.msk.f32.mxu0 %vm105_vm0, %v50_v36 }
  0x46   :  { %2413 = vmatpush3.bf16.msra.mxu0 %v2410_v26  ;;  %2432 = vmatpush3.bf16.msra.mxu1 %v2410_v26 }
  0x47   :  { %2415 = vmatprep.subr.bf16.mxu0 %v2414_v35  ;;  %2425 = vmatprep.subr.bf16.mxu1 %v2414_v35 }
  0x48   :  { %2200 = vmatmul.mubr.msk.f32.gmra.mrb[30].mxu0 %vm105_vm0, %v51_v37 }
  0x49   :  { %2202 = vmatprep.mubr.msk.f32.mxu0 %vm105_vm0, %v52_v38 }
  0x4a   :  { %2417 = vmatpush3.bf16.msra.mxu0 %v2414_v35  ;;  %2433 = vmatpush3.bf16.msra.mxu1 %v2414_v35 }
  0x4c   :  { %2203 = vmatmul.mubr.msk.f32.gmra.mrb[32].mxu0 %vm105_vm0, %v53_v39 }
  0x4d   :  { %2205 = vmatprep.mubr.msk.f32.mxu0 %vm105_vm0, %v54_v40 }
  0x50   :  { %2206 = vmatmul.mubr.msk.f32.gmra.mrb[34].mxu0 %vm105_vm0, %v55_v41 }
  0x51   :  { %2208 = vmatprep.mubr.msk.f32.mxu0 %vm105_vm0, %v56_v42 }
  0x54   :  { %2209 = vmatmul.mubr.msk.f32.gmra.mrb[36].mxu0 %vm105_vm0, %v57_v43 }
  0x55   :  { %2211 = vmatprep.mubr.msk.f32.mxu0 %vm105_vm0, %v58_v44 }
  0x58   :  { %2212 = vmatmul.mubr.msk.f32.gmra.mrb[38].mxu0 %vm105_vm0, %v59_v45 }
  0x59   :  { %2214 = vmatprep.mubr.msk.f32.mxu0 %vm105_vm0, %v60_v46 }
  0x5c   :  { %2215 = vmatmul.mubr.msk.f32.gmra.mrb[40].mxu0 %vm105_vm0, %v61_v47 }
  0x5d   :  { %2217 = vmatprep.mubr.msk.f32.mxu0 %vm105_vm0, %v62_v48 }
  0x60   :  { %2218 = vmatmul.mubr.msk.f32.gmra.mrb[42].mxu0 %vm105_vm0, %v63_v49 }
  0x61   :  { %2220 = vmatprep.mubr.msk.f32.mxu0 %vm105_vm0, %v64_v50 }
  0x64   :  { %2221 = vmatmul.mubr.msk.f32.gmra.mrb[44].mxu0 %vm105_vm0, %v65_v51 }
  0x65   :  { %2223 = vmatprep.mubr.msk.f32.mxu0 %vm105_vm0, %v66_v52 }
  0x68   :  { %2224 = vmatmul.mubr.msk.f32.gmra.mrb[46].mxu0 %vm105_vm0, %v67_v53 }
  0x69   :  { %2226 = vmatprep.mubr.msk.f32.mxu0 %vm105_vm0, %v68_v54 }
  0x6c   :  { %2227 = vmatmul.mubr.msk.f32.gmra.mrb[48].mxu0 %vm105_vm0, %v69_v55 }
  0x6d   :  { %2229 = vmatprep.mubr.msk.f32.mxu0 %vm105_vm0, %v70_v56 }
  0x70   :  { %2230 = vmatmul.mubr.msk.f32.gmra.mrb[50].mxu0 %vm105_vm0, %v71_v57 }
  0x71   :  { %2232 = vmatprep.mubr.msk.f32.mxu0 %vm105_vm0, %v72_v58 }
  0x74   :  { %2233 = vmatmul.mubr.msk.f32.gmra.mrb[52].mxu0 %vm105_vm0, %v73_v59 }
  0x75   :  { %2235 = vmatprep.mubr.msk.f32.mxu0 %vm105_vm0, %v74_v60 }
  0x78   :  { %2236 = vmatmul.mubr.msk.f32.gmra.mrb[54].mxu0 %vm105_vm0, %v75_v0 }
  0x79   :  { %2238 = vmatprep.mubr.msk.f32.mxu0 %vm105_vm0, %v76_v1 }
  0x7c   :  { %2239 = vmatmul.mubr.msk.f32.gmra.mrb[56].mxu0 %vm105_vm0, %v77_v2 }
  0x7d   :  { %2241 = vmatprep.mubr.msk.f32.mxu0 %vm105_vm0, %v78_v3 }
  0x80   :  { %2242 = vmatmul.mubr.msk.f32.gmra.mrb[58].mxu0 %vm105_vm0, %v79_v4 }
  0x81   :  { %2244 = vmatprep.mubr.msk.f32.mxu0 %vm105_vm0, %v80_v5 }
  0x84   :  { %2245 = vmatmul.mubr.msk.f32.gmra.mrb[60].mxu0 %vm105_vm0, %v81_v6 }
  0x85   :  { %2247 = vmatprep.mubr.msk.f32.mxu0 %vm105_vm0, %v82_v7 }
  0x88   :  { %2248 = vmatmul.mubr.msk.f32.gmra.mrb[62].mxu0 %vm105_vm0, %v83_v11 }
  0xdf   :  { %v2156_v28 = vpop.f32.mrb[0].mxu0 }
  0xe0   :  { %v364_v29 = vpop.f32.mrb[1].mxu0  ;;  %v690_v36 = vsub.f32 %v2869_v27, %v2156_v28 }
  0xe1   :  { %v689_v30 = vsub.f32 %v2869_v27, %v364_v29 }
  0xe3   :  { %753 = vmin.index.xlane.f32.xlu0 %v689_v30  ;;  %v2159_v31 = vpop.f32.mrb[2].mxu0 }
  0xe4   :  { %v374_v34 = vpop.f32.mrb[3].mxu0  ;;  %v692_v40 = vsub.f32 %v2869_v27, %v2159_v31 }
  0xe5   :  { %v691_v37 = vsub.f32 %v2869_v27, %v374_v34 }
  0xe7   :  { %755 = vmin.index.xlane.f32.xlu0 %v690_v36  ;;  %757 = vmin.index.xlane.f32.xlu1 %v691_v37  ;;  %v2162_v38 = vpop.f32.mrb[4].mxu0 }
  0xe8   :  { %v384_v39 = vpop.f32.mrb[5].mxu0  ;;  %v694_v44 = vsub.f32 %v2869_v27, %v2162_v38 }
  0xe9   :  { %v693_v41 = vsub.f32 %v2869_v27, %v384_v39 }
  0xeb   :  { %759 = vmin.index.xlane.f32.xlu1 %v692_v40  ;;  %761 = vmin.index.xlane.f32.xlu0 %v693_v41  ;;  %v2165_v42 = vpop.f32.mrb[6].mxu0 }
  0xec   :  { %v394_v43 = vpop.f32.mrb[7].mxu0  ;;  %v696_v48 = vsub.f32 %v2869_v27, %v2165_v42 }
  0xed   :  { %v695_v45 = vsub.f32 %v2869_v27, %v394_v43 }
  0xef   :  { %763 = vmin.index.xlane.f32.xlu1 %v694_v44  ;;  %765 = vmin.index.xlane.f32.xlu0 %v695_v45  ;;  %v2168_v46 = vpop.f32.mrb[8].mxu0 }
  0xf0   :  { %v404_v47 = vpop.f32.mrb[9].mxu0  ;;  %v698_v52 = vsub.f32 %v2869_v27, %v2168_v46 }
  0xf1   :  { %v697_v49 = vsub.f32 %v2869_v27, %v404_v47 }
  0xf3   :  { %767 = vmin.index.xlane.f32.xlu1 %v696_v48  ;;  %769 = vmin.index.xlane.f32.xlu0 %v697_v49  ;;  %v2171_v50 = vpop.f32.mrb[10].mxu0 }
  0xf4   :  { %v414_v51 = vpop.f32.mrb[11].mxu0  ;;  %v700_v56 = vsub.f32 %v2869_v27, %v2171_v50 }
  0xf5   :  { %v699_v53 = vsub.f32 %v2869_v27, %v414_v51 }
  0xf7   :  { %771 = vmin.index.xlane.f32.xlu1 %v698_v52  ;;  %773 = vmin.index.xlane.f32.xlu0 %v699_v53  ;;  %v2174_v54 = vpop.f32.mrb[12].mxu0 }
  0xf8   :  { %v424_v55 = vpop.f32.mrb[13].mxu0  ;;  %v702_v60 = vsub.f32 %v2869_v27, %v2174_v54 }
  0xf9   :  { %v701_v57 = vsub.f32 %v2869_v27, %v424_v55 }
  0xfb   :  { %775 = vmin.index.xlane.f32.xlu1 %v700_v56  ;;  %777 = vmin.index.xlane.f32.xlu0 %v701_v57  ;;  %v2177_v58 = vpop.f32.mrb[14].mxu0 }
  0xfc   :  { %v434_v59 = vpop.f32.mrb[15].mxu0  ;;  %v704_v0 = vsub.f32 %v2869_v27, %v2177_v58 }
  0xfd   :  { %v703_v61 = vsub.f32 %v2869_v27, %v434_v59 }
  0xff   :  { %779 = vmin.index.xlane.f32.xlu1 %v702_v60  ;;  %781 = vmin.index.xlane.f32.xlu0 %v703_v61  ;;  %v2180_v62 = vpop.f32.mrb[16].mxu0 }
 0x100   :  { %v444_v63 = vpop.f32.mrb[17].mxu0  ;;  %v706_v4 = vsub.f32 %v2869_v27, %v2180_v62 }
 0x101   :  { %v705_v1 = vsub.f32 %v2869_v27, %v444_v63 }
 0x103   :  { %783 = vmin.index.xlane.f32.xlu1 %v704_v0  ;;  %785 = vmin.index.xlane.f32.xlu0 %v705_v1  ;;  %v2183_v2 = vpop.f32.mrb[18].mxu0 }
 0x104   :  { %v454_v3 = vpop.f32.mrb[19].mxu0  ;;  %v708_v8 = vsub.f32 %v2869_v27, %v2183_v2 }
 0x105   :  { %v707_v5 = vsub.f32 %v2869_v27, %v454_v3 }
 0x107   :  { %787 = vmin.index.xlane.f32.xlu1 %v706_v4  ;;  %789 = vmin.index.xlane.f32.xlu0 %v707_v5  ;;  %v2186_v6 = vpop.f32.mrb[20].mxu0 }
 0x108   :  { %v464_v7 = vpop.f32.mrb[21].mxu0  ;;  %v710_v12 = vsub.f32 %v2869_v27, %v2186_v6 }
 0x109   :  { %v709_v9 = vsub.f32 %v2869_v27, %v464_v7 }
 0x10b   :  { %791 = vmin.index.xlane.f32.xlu1 %v708_v8  ;;  %793 = vmin.index.xlane.f32.xlu0 %v709_v9  ;;  %v2189_v10 = vpop.f32.mrb[22].mxu0 }
 0x10c   :  { %v474_v11 = vpop.f32.mrb[23].mxu0  ;;  %v712_v16 = vsub.f32 %v2869_v27, %v2189_v10 }
 0x10d   :  { %v711_v13 = vsub.f32 %v2869_v27, %v474_v11 }
 0x10f   :  { %795 = vmin.index.xlane.f32.xlu1 %v710_v12  ;;  %797 = vmin.index.xlane.f32.xlu0 %v711_v13  ;;  %v2192_v14 = vpop.f32.mrb[24].mxu0 }
 0x110   :  { %v484_v15 = vpop.f32.mrb[25].mxu0  ;;  %v714_v20 = vsub.f32 %v2869_v27, %v2192_v14 }
 0x111   :  { %v713_v17 = vsub.f32 %v2869_v27, %v484_v15 }
 0x113   :  { %799 = vmin.index.xlane.f32.xlu1 %v712_v16  ;;  %801 = vmin.index.xlane.f32.xlu0 %v713_v17  ;;  %v2195_v18 = vpop.f32.mrb[26].mxu0 }
 0x114   :  { %v494_v19 = vpop.f32.mrb[27].mxu0  ;;  %v716_v24 = vsub.f32 %v2869_v27, %v2195_v18 }
 0x115   :  { %v715_v21 = vsub.f32 %v2869_v27, %v494_v19 }
 0x117   :  { %803 = vmin.index.xlane.f32.xlu1 %v714_v20  ;;  %805 = vmin.index.xlane.f32.xlu0 %v715_v21  ;;  %v2198_v22 = vpop.f32.mrb[28].mxu0 }
 0x118   :  { %v504_v23 = vpop.f32.mrb[29].mxu0  ;;  %v718_v29 = vsub.f32 %v2869_v27, %v2198_v22 }
 0x119   :  { %v717_v25 = vsub.f32 %v2869_v27, %v504_v23 }
 0x11b   :  { %807 = vmin.index.xlane.f32.xlu1 %v716_v24  ;;  %809 = vmin.index.xlane.f32.xlu0 %v717_v25  ;;  %v2201_v26 = vpop.f32.mrb[30].mxu0 }
 0x11c   :  { %v514_v28 = vpop.f32.mrb[31].mxu0  ;;  %v720_v33 = vsub.f32 %v2869_v27, %v2201_v26 }
 0x11d   :  { %v719_v30 = vsub.f32 %v2869_v27, %v514_v28 }
 0x11f   :  { %811 = vmin.index.xlane.f32.xlu1 %v718_v29  ;;  %813 = vmin.index.xlane.f32.xlu0 %v719_v30  ;;  %v2204_v31 = vpop.f32.mrb[32].mxu0 }
 0x120   :  { %v524_v32 = vpop.f32.mrb[33].mxu0  ;;  %v722_v37 = vsub.f32 %v2869_v27, %v2204_v31 }
 0x121   :  { %v721_v34 = vsub.f32 %v2869_v27, %v524_v32 }
 0x123   :  { %815 = vmin.index.xlane.f32.xlu1 %v720_v33  ;;  %817 = vmin.index.xlane.f32.xlu0 %v721_v34  ;;  %v2207_v35 = vpop.f32.mrb[34].mxu0  ;;  %v881_v33 = vlaneseq }
 0x124   :  { %v534_v36 = vpop.f32.mrb[35].mxu0  ;;  %v724_v41 = vsub.f32 %v2869_v27, %v2207_v35 }
 0x125   :  { %v723_v38 = vsub.f32 %v2869_v27, %v534_v36  ;;  %v2941_v34 = vand.u32 127, %v881_v33  ;;  %v2524_v36 = vmov 1.0  }
 0x127   :  { %819 = vmin.index.xlane.f32.xlu1 %v722_v37  ;;  %821 = vmin.index.xlane.f32.xlu0 %v723_v38  ;;  %v2210_v39 = vpop.f32.mrb[36].mxu0 }
 0x128   :  { %v544_v40 = vpop.f32.mrb[37].mxu0  ;;  %v726_v45 = vsub.f32 %v2869_v27, %v2210_v39 }
 0x129   :  { %v725_v42 = vsub.f32 %v2869_v27, %v544_v40 }
 0x12b   :  { %823 = vmin.index.xlane.f32.xlu1 %v724_v41  ;;  %825 = vmin.index.xlane.f32.xlu0 %v725_v42  ;;  %v2213_v43 = vpop.f32.mrb[38].mxu0 }
 0x12c   :  { %v554_v44 = vpop.f32.mrb[39].mxu0  ;;  %v728_v49 = vsub.f32 %v2869_v27, %v2213_v43 }
 0x12d   :  { %v727_v46 = vsub.f32 %v2869_v27, %v554_v44 }
 0x12f   :  { %827 = vmin.index.xlane.f32.xlu1 %v726_v45  ;;  %829 = vmin.index.xlane.f32.xlu0 %v727_v46  ;;  %v2216_v47 = vpop.f32.mrb[40].mxu0 }
 0x130   :  { %v564_v48 = vpop.f32.mrb[41].mxu0  ;;  %v730_v53 = vsub.f32 %v2869_v27, %v2216_v47 }
 0x131   :  { %v729_v50 = vsub.f32 %v2869_v27, %v564_v48 }
 0x133   :  { %831 = vmin.index.xlane.f32.xlu1 %v728_v49  ;;  %833 = vmin.index.xlane.f32.xlu0 %v729_v50  ;;  %v2219_v51 = vpop.f32.mrb[42].mxu0 }
 0x134   :  { %v574_v52 = vpop.f32.mrb[43].mxu0  ;;  %v732_v57 = vsub.f32 %v2869_v27, %v2219_v51 }
 0x135   :  { %v731_v54 = vsub.f32 %v2869_v27, %v574_v52 }
 0x137   :  { %835 = vmin.index.xlane.f32.xlu1 %v730_v53  ;;  %837 = vmin.index.xlane.f32.xlu0 %v731_v54  ;;  %v2222_v55 = vpop.f32.mrb[44].mxu0 }
 0x138   :  { %v584_v56 = vpop.f32.mrb[45].mxu0  ;;  %v734_v61 = vsub.f32 %v2869_v27, %v2222_v55 }
 0x139   :  { %v733_v58 = vsub.f32 %v2869_v27, %v584_v56 }
 0x13b   :  { %839 = vmin.index.xlane.f32.xlu1 %v732_v57  ;;  %841 = vmin.index.xlane.f32.xlu0 %v733_v58  ;;  %v2225_v59 = vpop.f32.mrb[46].mxu0 }
 0x13c   :  { %v594_v60 = vpop.f32.mrb[47].mxu0  ;;  %v736_v1 = vsub.f32 %v2869_v27, %v2225_v59 }
 0x13d   :  { %v735_v62 = vsub.f32 %v2869_v27, %v594_v60 }
 0x13f   :  { %843 = vmin.index.xlane.f32.xlu1 %v734_v61  ;;  %845 = vmin.index.xlane.f32.xlu0 %v735_v62  ;;  %v2228_v63 = vpop.f32.mrb[48].mxu0 }
 0x140   :  { %v604_v0 = vpop.f32.mrb[49].mxu0  ;;  %v738_v5 = vsub.f32 %v2869_v27, %v2228_v63 }
 0x141   :  { %v737_v2 = vsub.f32 %v2869_v27, %v604_v0 }
 0x143   :  { %847 = vmin.index.xlane.f32.xlu1 %v736_v1  ;;  %849 = vmin.index.xlane.f32.xlu0 %v737_v2  ;;  %v2231_v3 = vpop.f32.mrb[50].mxu0 }
 0x144   :  { %v614_v4 = vpop.f32.mrb[51].mxu0  ;;  %v740_v9 = vsub.f32 %v2869_v27, %v2231_v3 }
 0x145   :  { %v739_v6 = vsub.f32 %v2869_v27, %v614_v4 }
 0x147   :  { %851 = vmin.index.xlane.f32.xlu1 %v738_v5  ;;  %853 = vmin.index.xlane.f32.xlu0 %v739_v6  ;;  %v2234_v7 = vpop.f32.mrb[52].mxu0 }
 0x148   :  { %v624_v8 = vpop.f32.mrb[53].mxu0  ;;  %v742_v13 = vsub.f32 %v2869_v27, %v2234_v7 }
 0x149   :  { %v741_v10 = vsub.f32 %v2869_v27, %v624_v8 }
 0x14b   :  { %855 = vmin.index.xlane.f32.xlu1 %v740_v9  ;;  %857 = vmin.index.xlane.f32.xlu0 %v741_v10  ;;  %v2237_v11 = vpop.f32.mrb[54].mxu0 }
 0x14c   :  { %v634_v12 = vpop.f32.mrb[55].mxu0  ;;  %v744_v17 = vsub.f32 %v2869_v27, %v2237_v11 }
 0x14d   :  { %v743_v14 = vsub.f32 %v2869_v27, %v634_v12 }
 0x14f   :  { %859 = vmin.index.xlane.f32.xlu1 %v742_v13  ;;  %861 = vmin.index.xlane.f32.xlu0 %v743_v14  ;;  %v2240_v15 = vpop.f32.mrb[56].mxu0 }
 0x150   :  { %v644_v16 = vpop.f32.mrb[57].mxu0  ;;  %v746_v21 = vsub.f32 %v2869_v27, %v2240_v15 }
 0x151   :  { %v745_v18 = vsub.f32 %v2869_v27, %v644_v16 }
 0x153   :  { %863 = vmin.index.xlane.f32.xlu1 %v744_v17  ;;  %865 = vmin.index.xlane.f32.xlu0 %v745_v18  ;;  %v2243_v19 = vpop.f32.mrb[58].mxu0 }
 0x154   :  { %v654_v20 = vpop.f32.mrb[59].mxu0  ;;  %v748_v25 = vsub.f32 %v2869_v27, %v2243_v19 }
 0x155   :  { %v747_v22 = vsub.f32 %v2869_v27, %v654_v20 }
 0x157   :  { %867 = vmin.index.xlane.f32.xlu1 %v746_v21  ;;  %869 = vmin.index.xlane.f32.xlu0 %v747_v22  ;;  %v2246_v23 = vpop.f32.mrb[60].mxu0 }
 0x158   :  { %v664_v24 = vpop.f32.mrb[61].mxu0  ;;  %v750_v30 = vsub.f32 %v2869_v27, %v2246_v23 }
 0x159   :  { %v749_v26 = vsub.f32 %v2869_v27, %v664_v24 }
 0x15b   :  { %871 = vmin.index.xlane.f32.xlu1 %v748_v25  ;;  %873 = vmin.index.xlane.f32.xlu0 %v749_v26  ;;  %v2249_v28 = vpop.f32.mrb[62].mxu0 }
 0x15c   :  { %v674_v29 = vpop.f32.mrb[63].mxu0  ;;  %v752_v32 = vsub.f32 %v2869_v27, %v2249_v28 }
 0x15d   :  { %v751_v31 = vsub.f32 %v2869_v27, %v674_v29 }
 0x15f   :  { %875 = vmin.index.xlane.f32.xlu1 %v750_v30  ;;  %877 = vmin.index.xlane.f32.xlu0 %v751_v31 }
 0x163   :  { %879 = vmin.index.xlane.f32.xlu1 %v752_v32 }
 0x170   :  { %v754_v35 = vpop.xlane.xlu0 %753 }
 0x171   :  { %vm883_vm1 = vcmp.eq.s32.totalorder %v2941_v34, %v754_v35 }
 0x172   :  { %2282 = vmatprep.mubr.msk.f32.mxu0 %vm883_vm1, %v2524_v36 }
 0x174   :  { %v756_v37 = vpop.xlane.xlu0 %755  ;;  %v758_v38 = vpop.xlane.xlu1 %757 }
 0x175   :  { %vm884_vm2 = vcmp.eq.s32.totalorder %v2941_v34, %v756_v37  ;;  %vm885_vm3 = vcmp.eq.s32.totalorder %v2941_v34, %v758_v38 }
 0x176   :  { %2283 = vmatmul.mubr.msk.f32.vlgmr.msra.gmra.mrb[64].mxu0 %vm884_vm2, %v2524_v36 }
 0x177   :  { %2285 = vmatprep.mubr.msk.f32.mxu0 %vm885_vm3, %v2524_v36 }
 0x178   :  { %v760_v27 = vpop.xlane.xlu1 %759  ;;  %v762_v39 = vpop.xlane.xlu0 %761 }
 0x179   :  { %vm886_vm4 = vcmp.eq.s32.totalorder %v2941_v34, %v760_v27  ;;  %vm887_vm5 = vcmp.eq.s32.totalorder %v2941_v34, %v762_v39  ;;  %v2436_v27 = vld [vmem:[%s3595_s0 + $0x8] sm:$0xff] }
 0x17a   :  { %2286 = vmatmul.mubr.msk.f32.gmra.mrb[66].mxu0 %vm886_vm4, %v2524_v36 }
 0x17b   :  { %2288 = vmatprep.mubr.msk.f32.mxu0 %vm887_vm5, %v2524_v36 }
 0x17c   :  { %v764_v40 = vpop.xlane.xlu1 %763  ;;  %v766_v41 = vpop.xlane.xlu0 %765 }
 0x17d   :  { %vm888_vm6 = vcmp.eq.s32.totalorder %v2941_v34, %v764_v40  ;;  %vm889_vm7 = vcmp.eq.s32.totalorder %v2941_v34, %v766_v41 }
 0x17e   :  { %2289 = vmatmul.mubr.msk.f32.gmra.mrb[68].mxu0 %vm888_vm6, %v2524_v36  ;;  %2291 = vmatprep.mubr.msk.f32.mxu1 %vm889_vm7, %v2524_v36 }
 0x180   :  { %v768_v42 = vpop.xlane.xlu1 %767  ;;  %v770_v43 = vpop.xlane.xlu0 %769 }
 0x181   :  { %vm890_vm8 = vcmp.eq.s32.totalorder %v2941_v34, %v768_v42  ;;  %vm891_vm9 = vcmp.eq.s32.totalorder %v2941_v34, %v770_v43 }
 0x182   :  { %2292 = vmatmul.mubr.msk.f32.vlgmr.msra.gmra.mrb[0].mxu1 %vm890_vm8, %v2524_v36 }
 0x183   :  { %2294 = vmatprep.mubr.msk.f32.mxu1 %vm891_vm9, %v2524_v36 }
 0x184   :  { %v772_v44 = vpop.xlane.xlu1 %771  ;;  %v774_v45 = vpop.xlane.xlu0 %773 }
 0x185   :  { %vm892_vm10 = vcmp.eq.s32.totalorder %v2941_v34, %v772_v44  ;;  %vm893_vm11 = vcmp.eq.s32.totalorder %v2941_v34, %v774_v45  ;;  %v2438_v45 = vld [vmem:[%s3595_s0 + $0x18] sm:$0xff] }
 0x186   :  { %2295 = vmatmul.mubr.msk.f32.gmra.mrb[2].mxu1 %vm892_vm10, %v2524_v36 }
 0x187   :  { %2297 = vmatprep.mubr.msk.f32.mxu1 %vm893_vm11, %v2524_v36 }
 0x188   :  { %v776_v46 = vpop.xlane.xlu1 %775  ;;  %v778_v47 = vpop.xlane.xlu0 %777 }
 0x189   :  { %vm894_vm12 = vcmp.eq.s32.totalorder %v2941_v34, %v776_v46  ;;  %vm895_vm13 = vcmp.eq.s32.totalorder %v2941_v34, %v778_v47 }
 0x18a   :  { %2298 = vmatmul.mubr.msk.f32.gmra.mrb[4].mxu1 %vm894_vm12, %v2524_v36 }
 0x18b   :  { %2300 = vmatprep.mubr.msk.f32.mxu1 %vm895_vm13, %v2524_v36 }
 0x18c   :  { %v780_v48 = vpop.xlane.xlu1 %779  ;;  %v782_v49 = vpop.xlane.xlu0 %781 }
 0x18d   :  { %vm896_vm14 = vcmp.eq.s32.totalorder %v2941_v34, %v780_v48  ;;  %vm897_vm15 = vcmp.eq.s32.totalorder %v2941_v34, %v782_v49  ;;  %v2439_v49 = vld [vmem:[%s3595_s0 + $0x10] sm:$0xff] }
 0x18e   :  { %2301 = vmatmul.mubr.msk.f32.gmra.mrb[6].mxu1 %vm896_vm14, %v2524_v36 }
 0x18f   :  { %2303 = vmatprep.mubr.msk.f32.mxu1 %vm897_vm15, %v2524_v36 }
 0x190   :  { %v784_v50 = vpop.xlane.xlu1 %783  ;;  %v786_v51 = vpop.xlane.xlu0 %785 }
 0x191   :  { %vm898_vm1 = vcmp.eq.s32.totalorder %v2941_v34, %v784_v50  ;;  %vm899_vm2 = vcmp.eq.s32.totalorder %v2941_v34, %v786_v51 }
 0x192   :  { %2304 = vmatmul.mubr.msk.f32.gmra.mrb[8].mxu1 %vm898_vm1, %v2524_v36 }
 0x193   :  { %2306 = vmatprep.mubr.msk.f32.mxu1 %vm899_vm2, %v2524_v36 }
 0x194   :  { %v788_v52 = vpop.xlane.xlu1 %787  ;;  %v790_v53 = vpop.xlane.xlu0 %789 }
 0x195   :  { %vm900_vm3 = vcmp.eq.s32.totalorder %v2941_v34, %v788_v52  ;;  %vm901_vm4 = vcmp.eq.s32.totalorder %v2941_v34, %v790_v53 }
 0x196   :  { %2307 = vmatmul.mubr.msk.f32.gmra.mrb[10].mxu1 %vm900_vm3, %v2524_v36 }
 0x197   :  { %2309 = vmatprep.mubr.msk.f32.mxu1 %vm901_vm4, %v2524_v36 }
 0x198   :  { %v792_v54 = vpop.xlane.xlu1 %791  ;;  %v794_v55 = vpop.xlane.xlu0 %793 }
 0x199   :  { %vm902_vm5 = vcmp.eq.s32.totalorder %v2941_v34, %v792_v54  ;;  %vm903_vm6 = vcmp.eq.s32.totalorder %v2941_v34, %v794_v55  ;;  %v2440_v55 = vld [vmem:[%s3595_s0 + $0x28] sm:$0xff] }
 0x19a   :  { %2310 = vmatmul.mubr.msk.f32.gmra.mrb[12].mxu1 %vm902_vm5, %v2524_v36 }
 0x19b   :  { %2312 = vmatprep.mubr.msk.f32.mxu1 %vm903_vm6, %v2524_v36 }
 0x19c   :  { %v796_v56 = vpop.xlane.xlu1 %795  ;;  %v798_v57 = vpop.xlane.xlu0 %797 }
 0x19d   :  { %vm904_vm7 = vcmp.eq.s32.totalorder %v2941_v34, %v796_v56  ;;  %vm905_vm8 = vcmp.eq.s32.totalorder %v2941_v34, %v798_v57 }
 0x19e   :  { %2313 = vmatmul.mubr.msk.f32.gmra.mrb[14].mxu1 %vm904_vm7, %v2524_v36 }
 0x19f   :  { %2315 = vmatprep.mubr.msk.f32.mxu1 %vm905_vm8, %v2524_v36 }
 0x1a0   :  { %v800_v58 = vpop.xlane.xlu1 %799  ;;  %v802_v59 = vpop.xlane.xlu0 %801 }
 0x1a1   :  { %vm906_vm9 = vcmp.eq.s32.totalorder %v2941_v34, %v800_v58  ;;  %vm907_vm10 = vcmp.eq.s32.totalorder %v2941_v34, %v802_v59  ;;  %v2441_v59 = vld [vmem:[%s3595_s0 + $0x20] sm:$0xff] }
 0x1a2   :  { %2316 = vmatmul.mubr.msk.f32.gmra.mrb[16].mxu1 %vm906_vm9, %v2524_v36 }
 0x1a3   :  { %2318 = vmatprep.mubr.msk.f32.mxu1 %vm907_vm10, %v2524_v36 }
 0x1a4   :  { %v804_v60 = vpop.xlane.xlu1 %803  ;;  %v806_v61 = vpop.xlane.xlu0 %805 }
 0x1a5   :  { %vm908_vm11 = vcmp.eq.s32.totalorder %v2941_v34, %v804_v60  ;;  %vm909_vm12 = vcmp.eq.s32.totalorder %v2941_v34, %v806_v61 }
 0x1a6   :  { %2319 = vmatmul.mubr.msk.f32.gmra.mrb[18].mxu1 %vm908_vm11, %v2524_v36 }
 0x1a7   :  { %2321 = vmatprep.mubr.msk.f32.mxu1 %vm909_vm12, %v2524_v36 }
 0x1a8   :  { %v808_v62 = vpop.xlane.xlu1 %807  ;;  %v810_v63 = vpop.xlane.xlu0 %809 }
 0x1a9   :  { %vm910_vm13 = vcmp.eq.s32.totalorder %v2941_v34, %v808_v62  ;;  %vm911_vm14 = vcmp.eq.s32.totalorder %v2941_v34, %v810_v63 }
 0x1aa   :  { %2322 = vmatmul.mubr.msk.f32.gmra.mrb[20].mxu1 %vm910_vm13, %v2524_v36 }
 0x1ab   :  { %2324 = vmatprep.mubr.msk.f32.mxu1 %vm911_vm14, %v2524_v36 }
 0x1ac   :  { %v812_v0 = vpop.xlane.xlu1 %811  ;;  %v814_v1 = vpop.xlane.xlu0 %813 }
 0x1ad   :  { %vm912_vm15 = vcmp.eq.s32.totalorder %v2941_v34, %v812_v0  ;;  %vm913_vm1 = vcmp.eq.s32.totalorder %v2941_v34, %v814_v1 }
 0x1ae   :  { %2325 = vmatmul.mubr.msk.f32.gmra.mrb[22].mxu1 %vm912_vm15, %v2524_v36 }
 0x1af   :  { %2327 = vmatprep.mubr.msk.f32.mxu1 %vm913_vm1, %v2524_v36 }
 0x1b0   :  { %v816_v2 = vpop.xlane.xlu1 %815  ;;  %v818_v3 = vpop.xlane.xlu0 %817 }
 0x1b1   :  { %vm914_vm2 = vcmp.eq.s32.totalorder %v2941_v34, %v816_v2  ;;  %vm915_vm3 = vcmp.eq.s32.totalorder %v2941_v34, %v818_v3  ;;  %v2442_v3 = vld [vmem:[%s3595_s0 + $0x38] sm:$0xff] }
 0x1b2   :  { %2328 = vmatmul.mubr.msk.f32.gmra.mrb[24].mxu1 %vm914_vm2, %v2524_v36 }
 0x1b3   :  { %2330 = vmatprep.mubr.msk.f32.mxu1 %vm915_vm3, %v2524_v36 }
 0x1b4   :  { %v820_v4 = vpop.xlane.xlu1 %819  ;;  %v822_v5 = vpop.xlane.xlu0 %821 }
 0x1b5   :  { %vm916_vm4 = vcmp.eq.s32.totalorder %v2941_v34, %v820_v4  ;;  %vm917_vm5 = vcmp.eq.s32.totalorder %v2941_v34, %v822_v5 }
 0x1b6   :  { %2331 = vmatmul.mubr.msk.f32.gmra.mrb[26].mxu1 %vm916_vm4, %v2524_v36 }
 0x1b7   :  { %2333 = vmatprep.mubr.msk.f32.mxu1 %vm917_vm5, %v2524_v36 }
 0x1b8   :  { %v824_v6 = vpop.xlane.xlu1 %823  ;;  %v826_v7 = vpop.xlane.xlu0 %825 }
 0x1b9   :  { %vm918_vm6 = vcmp.eq.s32.totalorder %v2941_v34, %v824_v6  ;;  %vm919_vm7 = vcmp.eq.s32.totalorder %v2941_v34, %v826_v7  ;;  %v2443_v7 = vld [vmem:[%s3595_s0 + $0x30] sm:$0xff] }
 0x1ba   :  { %2334 = vmatmul.mubr.msk.f32.gmra.mrb[28].mxu1 %vm918_vm6, %v2524_v36 }
 0x1bb   :  { %2336 = vmatprep.mubr.msk.f32.mxu1 %vm919_vm7, %v2524_v36 }
 0x1bc   :  { %v828_v8 = vpop.xlane.xlu1 %827  ;;  %v830_v9 = vpop.xlane.xlu0 %829 }
 0x1bd   :  { %vm920_vm8 = vcmp.eq.s32.totalorder %v2941_v34, %v828_v8  ;;  %vm921_vm9 = vcmp.eq.s32.totalorder %v2941_v34, %v830_v9 }
 0x1be   :  { %2337 = vmatmul.mubr.msk.f32.gmra.mrb[30].mxu1 %vm920_vm8, %v2524_v36 }
 0x1bf   :  { %2339 = vmatprep.mubr.msk.f32.mxu1 %vm921_vm9, %v2524_v36 }
 0x1c0   :  { %v832_v10 = vpop.xlane.xlu1 %831  ;;  %v834_v11 = vpop.xlane.xlu0 %833 }
 0x1c1   :  { %vm922_vm10 = vcmp.eq.s32.totalorder %v2941_v34, %v832_v10  ;;  %vm923_vm11 = vcmp.eq.s32.totalorder %v2941_v34, %v834_v11 }
 0x1c2   :  { %2340 = vmatmul.mubr.msk.f32.gmra.mrb[32].mxu1 %vm922_vm10, %v2524_v36 }
 0x1c3   :  { %2342 = vmatprep.mubr.msk.f32.mxu1 %vm923_vm11, %v2524_v36 }
 0x1c4   :  { %v836_v12 = vpop.xlane.xlu1 %835  ;;  %v838_v13 = vpop.xlane.xlu0 %837 }
 0x1c5   :  { %vm924_vm12 = vcmp.eq.s32.totalorder %v2941_v34, %v836_v12  ;;  %vm925_vm13 = vcmp.eq.s32.totalorder %v2941_v34, %v838_v13 }
 0x1c6   :  { %2343 = vmatmul.mubr.msk.f32.gmra.mrb[34].mxu1 %vm924_vm12, %v2524_v36 }
 0x1c7   :  { %2345 = vmatprep.mubr.msk.f32.mxu1 %vm925_vm13, %v2524_v36 }
 0x1c8   :  { %v840_v14 = vpop.xlane.xlu1 %839  ;;  %v842_v15 = vpop.xlane.xlu0 %841 }
 0x1c9   :  { %vm926_vm14 = vcmp.eq.s32.totalorder %v2941_v34, %v840_v14  ;;  %vm927_vm15 = vcmp.eq.s32.totalorder %v2941_v34, %v842_v15  ;;  %v2444_v15 = vld [vmem:[%s3595_s0 + $0x48] sm:$0xff] }
 0x1ca   :  { %2346 = vmatmul.mubr.msk.f32.gmra.mrb[36].mxu1 %vm926_vm14, %v2524_v36 }
 0x1cb   :  { %2348 = vmatprep.mubr.msk.f32.mxu1 %vm927_vm15, %v2524_v36 }
 0x1cc   :  { %v844_v16 = vpop.xlane.xlu1 %843  ;;  %v846_v17 = vpop.xlane.xlu0 %845 }
 0x1cd   :  { %vm928_vm1 = vcmp.eq.s32.totalorder %v2941_v34, %v844_v16  ;;  %vm929_vm2 = vcmp.eq.s32.totalorder %v2941_v34, %v846_v17 }
 0x1ce   :  { %2349 = vmatmul.mubr.msk.f32.gmra.mrb[38].mxu1 %vm928_vm1, %v2524_v36 }
 0x1cf   :  { %2351 = vmatprep.mubr.msk.f32.mxu1 %vm929_vm2, %v2524_v36 }
 0x1d0   :  { %v848_v18 = vpop.xlane.xlu1 %847  ;;  %v850_v19 = vpop.xlane.xlu0 %849 }
 0x1d1   :  { %vm930_vm3 = vcmp.eq.s32.totalorder %v2941_v34, %v848_v18  ;;  %vm931_vm4 = vcmp.eq.s32.totalorder %v2941_v34, %v850_v19  ;;  %v2445_v19 = vld [vmem:[%s3595_s0 + $0x40] sm:$0xff] }
 0x1d2   :  { %2352 = vmatmul.mubr.msk.f32.gmra.mrb[40].mxu1 %vm930_vm3, %v2524_v36 }
 0x1d3   :  { %2354 = vmatprep.mubr.msk.f32.mxu1 %vm931_vm4, %v2524_v36 }
 0x1d4   :  { %v852_v20 = vpop.xlane.xlu1 %851  ;;  %v854_v21 = vpop.xlane.xlu0 %853 }
 0x1d5   :  { %vm932_vm5 = vcmp.eq.s32.totalorder %v2941_v34, %v852_v20  ;;  %vm933_vm6 = vcmp.eq.s32.totalorder %v2941_v34, %v854_v21 }
 0x1d6   :  { %2355 = vmatmul.mubr.msk.f32.gmra.mrb[42].mxu1 %vm932_vm5, %v2524_v36  ;;  %vm1785_vm5 = vcmask 253952  }
 0x1d7   :  { %2357 = vmatprep.mubr.msk.f32.mxu1 %vm933_vm6, %v2524_v36 }
 0x1d8   :  { %v856_v22 = vpop.xlane.xlu1 %855  ;;  %v858_v23 = vpop.xlane.xlu0 %857 }
 0x1d9   :  { %vm934_vm7 = vcmp.eq.s32.totalorder %v2941_v34, %v856_v22  ;;  %vm935_vm8 = vcmp.eq.s32.totalorder %v2941_v34, %v858_v23 }
 0x1da   :  { %2358 = vmatmul.mubr.msk.f32.gmra.mrb[44].mxu1 %vm934_vm7, %v2524_v36 }
 0x1db   :  { %2360 = vmatprep.mubr.msk.f32.mxu1 %vm935_vm8, %v2524_v36 }
 0x1dc   :  { %v860_v24 = vpop.xlane.xlu1 %859  ;;  %v862_v25 = vpop.xlane.xlu0 %861 }
 0x1dd   :  { %vm936_vm9 = vcmp.eq.s32.totalorder %v2941_v34, %v860_v24  ;;  %vm937_vm10 = vcmp.eq.s32.totalorder %v2941_v34, %v862_v25 }
 0x1de   :  { %2361 = vmatmul.mubr.msk.f32.gmra.mrb[46].mxu1 %vm936_vm9, %v2524_v36 }
 0x1df   :  { %2363 = vmatprep.mubr.msk.f32.mxu1 %vm937_vm10, %v2524_v36 }
 0x1e0   :  { %v864_v26 = vpop.xlane.xlu1 %863  ;;  %v866_v28 = vpop.xlane.xlu0 %865 }
 0x1e1   :  { %vm938_vm11 = vcmp.eq.s32.totalorder %v2941_v34, %v864_v26  ;;  %vm939_vm12 = vcmp.eq.s32.totalorder %v2941_v34, %v866_v28  ;;  %v2446_v28 = vld [vmem:[%s3595_s0 + $0x58] sm:$0xff] }
 0x1e2   :  { %2364 = vmatmul.mubr.msk.f32.gmra.mrb[48].mxu1 %vm938_vm11, %v2524_v36 }
 0x1e3   :  { %2366 = vmatprep.mubr.msk.f32.mxu1 %vm939_vm12, %v2524_v36 }
 0x1e4   :  { %v868_v29 = vpop.xlane.xlu1 %867  ;;  %v870_v30 = vpop.xlane.xlu0 %869 }
 0x1e5   :  { %vm940_vm13 = vcmp.eq.s32.totalorder %v2941_v34, %v868_v29  ;;  %vm941_vm14 = vcmp.eq.s32.totalorder %v2941_v34, %v870_v30 }
 0x1e6   :  { %2367 = vmatmul.mubr.msk.f32.gmra.mrb[50].mxu1 %vm940_vm13, %v2524_v36 }
 0x1e7   :  { %2369 = vmatprep.mubr.msk.f32.mxu1 %vm941_vm14, %v2524_v36 }
 0x1e8   :  { %v872_v31 = vpop.xlane.xlu1 %871  ;;  %v874_v32 = vpop.xlane.xlu0 %873 }
 0x1e9   :  { %vm942_vm15 = vcmp.eq.s32.totalorder %v2941_v34, %v872_v31  ;;  %vm943_vm1 = vcmp.eq.s32.totalorder %v2941_v34, %v874_v32  ;;  %v2447_v32 = vld [vmem:[%s3595_s0 + $0x50] sm:$0xff] }
 0x1ea   :  { %2370 = vmatmul.mubr.msk.f32.gmra.mrb[52].mxu1 %vm942_vm15, %v2524_v36 }
 0x1eb   :  { %2372 = vmatprep.mubr.msk.f32.mxu1 %vm943_vm1, %v2524_v36 }
 0x1ec   :  { %v876_v33 = vpop.xlane.xlu1 %875  ;;  %v878_v35 = vpop.xlane.xlu0 %877 }
 0x1ed   :  { %vm944_vm2 = vcmp.eq.s32.totalorder %v2941_v34, %v876_v33  ;;  %vm945_vm3 = vcmp.eq.s32.totalorder %v2941_v34, %v878_v35 }
 0x1ee   :  { %2373 = vmatmul.mubr.msk.f32.gmra.mrb[54].mxu1 %vm944_vm2, %v2524_v36 }
 0x1ef   :  { %2375 = vmatprep.mubr.msk.f32.mxu1 %vm945_vm3, %v2524_v36 }
 0x1f0   :  { %v880_v37 = vpop.xlane.xlu1 %879 }
 0x1f1   :  { %vm946_vm4 = vcmp.eq.s32.totalorder %v2941_v34, %v880_v37  ;;  %v2437_v34 = vld [vmem:[%s3595_s0] sm:$0xff] }
 0x1f2   :  { %2376 = vmatmul.mubr.msk.f32.gmra.mrb[56].mxu1 %vm946_vm4, %v2524_v36 }
 0x249   :  { %v2284_v38 = vpop.f32.mrb[64].mxu0 }
 0x24a   :  { %1461 = vst.msk [vmem:[%s3599_s4 + $0x8] sm:$0xff] %vm105_vm0, %v2284_v38  ;;  %v1525_v39 = vsub.f32 %v2284_v38, %v2436_v27  ;;  %v1141_v40 = vpop.f32.mrb[65].mxu0 }
 0x24b   :  { %1460 = vst.msk [vmem:[%s3599_s4] sm:$0xff] %vm105_vm0, %v1141_v40  ;;  %v1524_v36 = vsub.f32 %v1141_v40, %v2437_v34  ;;  %v2448_v34 = vld [vmem:[%s3595_s0 + $0x68] sm:$0xff] }
 0x24c   :  { %v1589_v41 = vmul.f32 %v1525_v39, %v1525_v39 }
 0x24d   :  { %v1588_v42 = vmul.f32 %v1524_v36, %v1524_v36  ;;  %v2287_v43 = vpop.f32.mrb[66].mxu0 }
 0x24e   :  { %v1653_v44 = vsel %vm105_vm0, %v1589_v41, 0.0  ;;  %1463 = vst.msk [vmem:[%s3599_s4 + $0x18] sm:$0xff] %vm105_vm0, %v2287_v43  ;;  %v1527_v46 = vsub.f32 %v2287_v43, %v2438_v45  ;;  %v1151_v47 = vpop.f32.mrb[67].mxu0  ;;  %v2449_v43 = vld [vmem:[%s3595_s0 + $0x60] sm:$0xff] }
 0x24f   :  { %v1652_v48 = vsel %vm105_vm0, %v1588_v42, 0.0  ;;  %1462 = vst.msk [vmem:[%s3599_s4 + $0x10] sm:$0xff] %vm105_vm0, %v1151_v47  ;;  %v1526_v50 = vsub.f32 %v1151_v47, %v2439_v49 }
 0x250   :  { %v1654_v51 = vadd.f32 %v1653_v44, %v1652_v48  ;;  %v1591_v52 = vmul.f32 %v1527_v46, %v1527_v46 }
 0x251   :  { %v1590_v53 = vmul.f32 %v1526_v50, %v1526_v50  ;;  %v2290_v54 = vpop.f32.mrb[68].mxu0 }
 0x252   :  { %1465 = vst.msk [vmem:[%s3599_s4 + $0x28] sm:$0xff] %vm105_vm0, %v2290_v54  ;;  %v1529_v56 = vsub.f32 %v2290_v54, %v2440_v55  ;;  %v1161_v57 = vpop.f32.mrb[69].mxu0  ;;  %v1657_v62 = vsel %vm105_vm0, %v1591_v52, 0.0  ;;  %v2451_v55 = vld [vmem:[%s3595_s0 + $0x70] sm:$0xff] }
 0x253   :  { %v1655_v58 = vsel %vm105_vm0, %v1590_v53, 0.0  ;;  %1464 = vst.msk [vmem:[%s3599_s4 + $0x20] sm:$0xff] %vm105_vm0, %v1161_v57  ;;  %v1528_v60 = vsub.f32 %v1161_v57, %v2441_v59 }
 0x254   :  { %v1656_v61 = vadd.f32 %v1655_v58, %v1654_v51  ;;  %v1593_v63 = vmul.f32 %v1529_v56, %v1529_v56  ;;  %v2450_v51 = vld [vmem:[%s3595_s0 + $0x78] sm:$0xff] }
 0x255   :  { %v1592_v0 = vmul.f32 %v1528_v60, %v1528_v60  ;;  %v2293_v1 = vpop.f32.mrb[0].mxu1 }
 0x256   :  { %v1658_v2 = vadd.f32 %v1657_v62, %v1656_v61  ;;  %1467 = vst.msk [vmem:[%s3599_s4 + $0x38] sm:$0xff] %vm105_vm0, %v2293_v1  ;;  %v1531_v4 = vsub.f32 %v2293_v1, %v2442_v3  ;;  %v1171_v5 = vpop.f32.mrb[1].mxu1  ;;  %v1661_v10 = vsel %vm105_vm0, %v1593_v63, 0.0  ;;  %v2452_v63 = vld [vmem:[%s3595_s0 + $0x88] sm:$0xff]  ;;  %v2453_v3 = vld [vmem:[%s3595_s0 + $0x80] sm:$0xff] }
 0x257   :  { %v1659_v6 = vsel %vm105_vm0, %v1592_v0, 0.0  ;;  %1466 = vst.msk [vmem:[%s3599_s4 + $0x30] sm:$0xff] %vm105_vm0, %v1171_v5  ;;  %v1530_v8 = vsub.f32 %v1171_v5, %v2443_v7 }
 0x258   :  { %v1660_v9 = vadd.f32 %v1659_v6, %v1658_v2  ;;  %v1595_v11 = vmul.f32 %v1531_v4, %v1531_v4 }
 0x259   :  { %v1594_v12 = vmul.f32 %v1530_v8, %v1530_v8  ;;  %v2296_v13 = vpop.f32.mrb[2].mxu1 }
 0x25a   :  { %v1662_v14 = vadd.f32 %v1661_v10, %v1660_v9  ;;  %1469 = vst.msk [vmem:[%s3599_s4 + $0x48] sm:$0xff] %vm105_vm0, %v2296_v13  ;;  %v1533_v16 = vsub.f32 %v2296_v13, %v2444_v15  ;;  %v1181_v17 = vpop.f32.mrb[3].mxu1  ;;  %v1665_v22 = vsel %vm105_vm0, %v1595_v11, 0.0  ;;  %v2454_v11 = vld [vmem:[%s3595_s0 + $0x98] sm:$0xff]  ;;  %v2455_v15 = vld [vmem:[%s3595_s0 + $0x90] sm:$0xff] }
 0x25b   :  { %v1663_v18 = vsel %vm105_vm0, %v1594_v12, 0.0  ;;  %1468 = vst.msk [vmem:[%s3599_s4 + $0x40] sm:$0xff] %vm105_vm0, %v1181_v17  ;;  %v1532_v20 = vsub.f32 %v1181_v17, %v2445_v19 }
 0x25c   :  { %v1664_v21 = vadd.f32 %v1663_v18, %v1662_v14  ;;  %v1597_v23 = vmul.f32 %v1533_v16, %v1533_v16 }
 0x25d   :  { %v1596_v24 = vmul.f32 %v1532_v20, %v1532_v20  ;;  %v2299_v25 = vpop.f32.mrb[4].mxu1 }
 0x25e   :  { %v1666_v26 = vadd.f32 %v1665_v22, %v1664_v21  ;;  %1471 = vst.msk [vmem:[%s3599_s4 + $0x58] sm:$0xff] %vm105_vm0, %v2299_v25  ;;  %v1535_v29 = vsub.f32 %v2299_v25, %v2446_v28  ;;  %v1191_v30 = vpop.f32.mrb[5].mxu1  ;;  %v1669_v37 = vsel %vm105_vm0, %v1597_v23, 0.0  ;;  %v2456_v23 = vld [vmem:[%s3595_s0 + $0xa8] sm:$0xff]  ;;  %v2457_v28 = vld [vmem:[%s3595_s0 + $0xa0] sm:$0xff] }
 0x25f   :  { %v1667_v31 = vsel %vm105_vm0, %v1596_v24, 0.0  ;;  %1470 = vst.msk [vmem:[%s3599_s4 + $0x50] sm:$0xff] %vm105_vm0, %v1191_v30  ;;  %v1534_v33 = vsub.f32 %v1191_v30, %v2447_v32 }
 0x260   :  { %v1668_v35 = vadd.f32 %v1667_v31, %v1666_v26  ;;  %v1599_v38 = vmul.f32 %v1535_v29, %v1535_v29 }
 0x261   :  { %v1598_v27 = vmul.f32 %v1534_v33, %v1534_v33  ;;  %v2302_v39 = vpop.f32.mrb[6].mxu1 }
 0x262   :  { %v1670_v40 = vadd.f32 %v1669_v37, %v1668_v35  ;;  %1473 = vst.msk [vmem:[%s3599_s4 + $0x68] sm:$0xff] %vm105_vm0, %v2302_v39  ;;  %v1537_v36 = vsub.f32 %v2302_v39, %v2448_v34  ;;  %v1201_v41 = vpop.f32.mrb[7].mxu1  ;;  %v1673_v46 = vsel %vm105_vm0, %v1599_v38, 0.0  ;;  %v2458_v38 = vld [vmem:[%s3595_s0 + $0xb8] sm:$0xff]  ;;  %v2459_v34 = vld [vmem:[%s3595_s0 + $0xb0] sm:$0xff] }
 0x263   :  { %v1671_v42 = vsel %vm105_vm0, %v1598_v27, 0.0  ;;  %1472 = vst.msk [vmem:[%s3599_s4 + $0x60] sm:$0xff] %vm105_vm0, %v1201_v41  ;;  %v1536_v44 = vsub.f32 %v1201_v41, %v2449_v43 }
 0x264   :  { %v1672_v45 = vadd.f32 %v1671_v42, %v1670_v40  ;;  %v1601_v47 = vmul.f32 %v1537_v36, %v1537_v36 }
 0x265   :  { %v1600_v48 = vmul.f32 %v1536_v44, %v1536_v44  ;;  %v2305_v49 = vpop.f32.mrb[8].mxu1 }
 0x266   :  { %v1674_v50 = vadd.f32 %v1673_v46, %v1672_v45  ;;  %1475 = vst.msk [vmem:[%s3599_s4 + $0x78] sm:$0xff] %vm105_vm0, %v2305_v49  ;;  %v1539_v52 = vsub.f32 %v2305_v49, %v2450_v51  ;;  %v1211_v53 = vpop.f32.mrb[9].mxu1  ;;  %v1677_v58 = vsel %vm105_vm0, %v1601_v47, 0.0  ;;  %v2460_v47 = vld [vmem:[%s3595_s0 + $0xc8] sm:$0xff]  ;;  %v2461_v51 = vld [vmem:[%s3595_s0 + $0xc0] sm:$0xff] }
 0x267   :  { %v1675_v54 = vsel %vm105_vm0, %v1600_v48, 0.0  ;;  %1474 = vst.msk [vmem:[%s3599_s4 + $0x70] sm:$0xff] %vm105_vm0, %v1211_v53  ;;  %v1538_v56 = vsub.f32 %v1211_v53, %v2451_v55 }
 0x268   :  { %v1676_v57 = vadd.f32 %v1675_v54, %v1674_v50  ;;  %v1603_v59 = vmul.f32 %v1539_v52, %v1539_v52 }
 0x269   :  { %v1602_v60 = vmul.f32 %v1538_v56, %v1538_v56  ;;  %v2308_v61 = vpop.f32.mrb[10].mxu1 }
 0x26a   :  { %v1678_v62 = vadd.f32 %v1677_v58, %v1676_v57  ;;  %1477 = vst.msk [vmem:[%s3599_s4 + $0x88] sm:$0xff] %vm105_vm0, %v2308_v61  ;;  %v1541_v0 = vsub.f32 %v2308_v61, %v2452_v63  ;;  %v1221_v1 = vpop.f32.mrb[11].mxu1  ;;  %v1681_v6 = vsel %vm105_vm0, %v1603_v59, 0.0  ;;  %v2462_v59 = vld [vmem:[%s3595_s0 + $0xd8] sm:$0xff]  ;;  %v2463_v63 = vld [vmem:[%s3595_s0 + $0xd0] sm:$0xff] }
 0x26b   :  { %v1679_v2 = vsel %vm105_vm0, %v1602_v60, 0.0  ;;  %1476 = vst.msk [vmem:[%s3599_s4 + $0x80] sm:$0xff] %vm105_vm0, %v1221_v1  ;;  %v1540_v4 = vsub.f32 %v1221_v1, %v2453_v3 }
 0x26c   :  { %v1680_v5 = vadd.f32 %v1679_v2, %v1678_v62  ;;  %v1605_v7 = vmul.f32 %v1541_v0, %v1541_v0 }
 0x26d   :  { %v1604_v8 = vmul.f32 %v1540_v4, %v1540_v4  ;;  %v2311_v9 = vpop.f32.mrb[12].mxu1 }
 0x26e   :  { %v1682_v10 = vadd.f32 %v1681_v6, %v1680_v5  ;;  %1479 = vst.msk [vmem:[%s3599_s4 + $0x98] sm:$0xff] %vm105_vm0, %v2311_v9  ;;  %v1543_v12 = vsub.f32 %v2311_v9, %v2454_v11  ;;  %v1231_v13 = vpop.f32.mrb[13].mxu1  ;;  %v1685_v18 = vsel %vm105_vm0, %v1605_v7, 0.0  ;;  %v2464_v7 = vld [vmem:[%s3595_s0 + $0xe8] sm:$0xff]  ;;  %v2465_v11 = vld [vmem:[%s3595_s0 + $0xe0] sm:$0xff] }
 0x26f   :  { %v1683_v14 = vsel %vm105_vm0, %v1604_v8, 0.0  ;;  %1478 = vst.msk [vmem:[%s3599_s4 + $0x90] sm:$0xff] %vm105_vm0, %v1231_v13  ;;  %v1542_v16 = vsub.f32 %v1231_v13, %v2455_v15 }
 0x270   :  { %v1684_v17 = vadd.f32 %v1683_v14, %v1682_v10  ;;  %v1607_v19 = vmul.f32 %v1543_v12, %v1543_v12 }
 0x271   :  { %v1606_v20 = vmul.f32 %v1542_v16, %v1542_v16  ;;  %v2314_v21 = vpop.f32.mrb[14].mxu1 }
 0x272   :  { %v1686_v22 = vadd.f32 %v1685_v18, %v1684_v17  ;;  %1481 = vst.msk [vmem:[%s3599_s4 + $0xa8] sm:$0xff] %vm105_vm0, %v2314_v21  ;;  %v1545_v24 = vsub.f32 %v2314_v21, %v2456_v23  ;;  %v1241_v25 = vpop.f32.mrb[15].mxu1  ;;  %v1689_v31 = vsel %vm105_vm0, %v1607_v19, 0.0  ;;  %v2466_v19 = vld [vmem:[%s3595_s0 + $0xf8] sm:$0xff]  ;;  %v2467_v23 = vld [vmem:[%s3595_s0 + $0xf0] sm:$0xff] }
 0x273   :  { %v1687_v26 = vsel %vm105_vm0, %v1606_v20, 0.0  ;;  %1480 = vst.msk [vmem:[%s3599_s4 + $0xa0] sm:$0xff] %vm105_vm0, %v1241_v25  ;;  %v1544_v29 = vsub.f32 %v1241_v25, %v2457_v28 }
 0x274   :  { %v1688_v30 = vadd.f32 %v1687_v26, %v1686_v22  ;;  %v1609_v32 = vmul.f32 %v1545_v24, %v1545_v24 }
 0x275   :  { %v1608_v33 = vmul.f32 %v1544_v29, %v1544_v29  ;;  %v2317_v35 = vpop.f32.mrb[16].mxu1 }
 0x276   :  { %v1690_v37 = vadd.f32 %v1689_v31, %v1688_v30  ;;  %1483 = vst.msk [vmem:[%s3599_s4 + $0xb8] sm:$0xff] %vm105_vm0, %v2317_v35  ;;  %v1547_v27 = vsub.f32 %v2317_v35, %v2458_v38  ;;  %v1251_v39 = vpop.f32.mrb[17].mxu1  ;;  %v1693_v42 = vsel %vm105_vm0, %v1609_v32, 0.0  ;;  %v2468_v32 = vld [vmem:[%s3595_s0 + $0x108] sm:$0xff]  ;;  %v2469_v38 = vld [vmem:[%s3595_s0 + $0x100] sm:$0xff] }
 0x277   :  { %v1691_v40 = vsel %vm105_vm0, %v1608_v33, 0.0  ;;  %1482 = vst.msk [vmem:[%s3599_s4 + $0xb0] sm:$0xff] %vm105_vm0, %v1251_v39  ;;  %v1546_v36 = vsub.f32 %v1251_v39, %v2459_v34 }
 0x278   :  { %v1692_v41 = vadd.f32 %v1691_v40, %v1690_v37  ;;  %v1611_v43 = vmul.f32 %v1547_v27, %v1547_v27 }
 0x279   :  { %v1610_v44 = vmul.f32 %v1546_v36, %v1546_v36  ;;  %v2320_v45 = vpop.f32.mrb[18].mxu1 }
 0x27a   :  { %v1694_v46 = vadd.f32 %v1693_v42, %v1692_v41  ;;  %1485 = vst.msk [vmem:[%s3599_s4 + $0xc8] sm:$0xff] %vm105_vm0, %v2320_v45  ;;  %v1549_v48 = vsub.f32 %v2320_v45, %v2460_v47  ;;  %v1261_v49 = vpop.f32.mrb[19].mxu1  ;;  %v1697_v54 = vsel %vm105_vm0, %v1611_v43, 0.0  ;;  %v2470_v43 = vld [vmem:[%s3595_s0 + $0x118] sm:$0xff]  ;;  %v2471_v47 = vld [vmem:[%s3595_s0 + $0x110] sm:$0xff] }
 0x27b   :  { %v1695_v50 = vsel %vm105_vm0, %v1610_v44, 0.0  ;;  %1484 = vst.msk [vmem:[%s3599_s4 + $0xc0] sm:$0xff] %vm105_vm0, %v1261_v49  ;;  %v1548_v52 = vsub.f32 %v1261_v49, %v2461_v51 }
 0x27c   :  { %v1696_v53 = vadd.f32 %v1695_v50, %v1694_v46  ;;  %v1613_v55 = vmul.f32 %v1549_v48, %v1549_v48 }
 0x27d   :  { %v1612_v56 = vmul.f32 %v1548_v52, %v1548_v52  ;;  %v2323_v57 = vpop.f32.mrb[20].mxu1 }
 0x27e   :  { %v1698_v58 = vadd.f32 %v1697_v54, %v1696_v53  ;;  %1487 = vst.msk [vmem:[%s3599_s4 + $0xd8] sm:$0xff] %vm105_vm0, %v2323_v57  ;;  %v1551_v60 = vsub.f32 %v2323_v57, %v2462_v59  ;;  %v1271_v61 = vpop.f32.mrb[21].mxu1  ;;  %v1701_v2 = vsel %vm105_vm0, %v1613_v55, 0.0  ;;  %v2472_v55 = vld [vmem:[%s3595_s0 + $0x128] sm:$0xff]  ;;  %v2473_v59 = vld [vmem:[%s3595_s0 + $0x120] sm:$0xff] }
 0x27f   :  { %v1699_v62 = vsel %vm105_vm0, %v1612_v56, 0.0  ;;  %1486 = vst.msk [vmem:[%s3599_s4 + $0xd0] sm:$0xff] %vm105_vm0, %v1271_v61  ;;  %v1550_v0 = vsub.f32 %v1271_v61, %v2463_v63 }
 0x280   :  { %v1700_v1 = vadd.f32 %v1699_v62, %v1698_v58  ;;  %v1615_v3 = vmul.f32 %v1551_v60, %v1551_v60 }
 0x281   :  { %v1614_v4 = vmul.f32 %v1550_v0, %v1550_v0  ;;  %v2326_v5 = vpop.f32.mrb[22].mxu1 }
 0x282   :  { %v1702_v6 = vadd.f32 %v1701_v2, %v1700_v1  ;;  %1489 = vst.msk [vmem:[%s3599_s4 + $0xe8] sm:$0xff] %vm105_vm0, %v2326_v5  ;;  %v1553_v8 = vsub.f32 %v2326_v5, %v2464_v7  ;;  %v1281_v9 = vpop.f32.mrb[23].mxu1  ;;  %v1705_v14 = vsel %vm105_vm0, %v1615_v3, 0.0  ;;  %v2474_v3 = vld [vmem:[%s3595_s0 + $0x138] sm:$0xff]  ;;  %v2475_v7 = vld [vmem:[%s3595_s0 + $0x130] sm:$0xff] }
 0x283   :  { %v1703_v10 = vsel %vm105_vm0, %v1614_v4, 0.0  ;;  %1488 = vst.msk [vmem:[%s3599_s4 + $0xe0] sm:$0xff] %vm105_vm0, %v1281_v9  ;;  %v1552_v12 = vsub.f32 %v1281_v9, %v2465_v11 }
 0x284   :  { %v1704_v13 = vadd.f32 %v1703_v10, %v1702_v6  ;;  %v1617_v15 = vmul.f32 %v1553_v8, %v1553_v8 }
 0x285   :  { %v1616_v16 = vmul.f32 %v1552_v12, %v1552_v12  ;;  %v2329_v17 = vpop.f32.mrb[24].mxu1 }
 0x286   :  { %v1706_v18 = vadd.f32 %v1705_v14, %v1704_v13  ;;  %1491 = vst.msk [vmem:[%s3599_s4 + $0xf8] sm:$0xff] %vm105_vm0, %v2329_v17  ;;  %v1555_v20 = vsub.f32 %v2329_v17, %v2466_v19  ;;  %v1291_v21 = vpop.f32.mrb[25].mxu1  ;;  %v1709_v26 = vsel %vm105_vm0, %v1617_v15, 0.0  ;;  %v2476_v15 = vld [vmem:[%s3595_s0 + $0x148] sm:$0xff]  ;;  %v2477_v19 = vld [vmem:[%s3595_s0 + $0x140] sm:$0xff] }
 0x287   :  { %v1707_v22 = vsel %vm105_vm0, %v1616_v16, 0.0  ;;  %1490 = vst.msk [vmem:[%s3599_s4 + $0xf0] sm:$0xff] %vm105_vm0, %v1291_v21  ;;  %v1554_v24 = vsub.f32 %v1291_v21, %v2467_v23 }
 0x288   :  { %v1708_v25 = vadd.f32 %v1707_v22, %v1706_v18  ;;  %v1619_v28 = vmul.f32 %v1555_v20, %v1555_v20 }
 0x289   :  { %v1618_v29 = vmul.f32 %v1554_v24, %v1554_v24  ;;  %v2332_v30 = vpop.f32.mrb[26].mxu1 }
 0x28a   :  { %v1710_v31 = vadd.f32 %v1709_v26, %v1708_v25  ;;  %1493 = vst.msk [vmem:[%s3599_s4 + $0x108] sm:$0xff] %vm105_vm0, %v2332_v30  ;;  %v1557_v33 = vsub.f32 %v2332_v30, %v2468_v32  ;;  %v1301_v35 = vpop.f32.mrb[27].mxu1  ;;  %v1713_v40 = vsel %vm105_vm0, %v1619_v28, 0.0  ;;  %v2478_v28 = vld [vmem:[%s3595_s0 + $0x158] sm:$0xff]  ;;  %v2479_v32 = vld [vmem:[%s3595_s0 + $0x150] sm:$0xff] }
 0x28b   :  { %v1711_v37 = vsel %vm105_vm0, %v1618_v29, 0.0  ;;  %1492 = vst.msk [vmem:[%s3599_s4 + $0x100] sm:$0xff] %vm105_vm0, %v1301_v35  ;;  %v1556_v27 = vsub.f32 %v1301_v35, %v2469_v38 }
 0x28c   :  { %v1712_v39 = vadd.f32 %v1711_v37, %v1710_v31  ;;  %v1621_v34 = vmul.f32 %v1557_v33, %v1557_v33 }
 0x28d   :  { %v1620_v36 = vmul.f32 %v1556_v27, %v1556_v27  ;;  %v2335_v41 = vpop.f32.mrb[28].mxu1 }
 0x28e   :  { %v1714_v42 = vadd.f32 %v1713_v40, %v1712_v39  ;;  %1495 = vst.msk [vmem:[%s3599_s4 + $0x118] sm:$0xff] %vm105_vm0, %v2335_v41  ;;  %v1559_v44 = vsub.f32 %v2335_v41, %v2470_v43  ;;  %v1311_v45 = vpop.f32.mrb[29].mxu1  ;;  %v1717_v50 = vsel %vm105_vm0, %v1621_v34, 0.0  ;;  %v2480_v34 = vld [vmem:[%s3595_s0 + $0x168] sm:$0xff]  ;;  %v2481_v43 = vld [vmem:[%s3595_s0 + $0x160] sm:$0xff] }
 0x28f   :  { %v1715_v46 = vsel %vm105_vm0, %v1620_v36, 0.0  ;;  %1494 = vst.msk [vmem:[%s3599_s4 + $0x110] sm:$0xff] %vm105_vm0, %v1311_v45  ;;  %v1558_v48 = vsub.f32 %v1311_v45, %v2471_v47 }
 0x290   :  { %v1716_v49 = vadd.f32 %v1715_v46, %v1714_v42  ;;  %v1623_v51 = vmul.f32 %v1559_v44, %v1559_v44 }
 0x291   :  { %v1622_v52 = vmul.f32 %v1558_v48, %v1558_v48  ;;  %v2338_v53 = vpop.f32.mrb[30].mxu1 }
 0x292   :  { %v1718_v54 = vadd.f32 %v1717_v50, %v1716_v49  ;;  %1497 = vst.msk [vmem:[%s3599_s4 + $0x128] sm:$0xff] %vm105_vm0, %v2338_v53  ;;  %v1561_v56 = vsub.f32 %v2338_v53, %v2472_v55  ;;  %v1321_v57 = vpop.f32.mrb[31].mxu1  ;;  %v1721_v62 = vsel %vm105_vm0, %v1623_v51, 0.0  ;;  %v2482_v51 = vld [vmem:[%s3595_s0 + $0x178] sm:$0xff]  ;;  %v2483_v55 = vld [vmem:[%s3595_s0 + $0x170] sm:$0xff] }
 0x293   :  { %v1719_v58 = vsel %vm105_vm0, %v1622_v52, 0.0  ;;  %1496 = vst.msk [vmem:[%s3599_s4 + $0x120] sm:$0xff] %vm105_vm0, %v1321_v57  ;;  %v1560_v60 = vsub.f32 %v1321_v57, %v2473_v59 }
 0x294   :  { %v1720_v61 = vadd.f32 %v1719_v58, %v1718_v54  ;;  %v1625_v63 = vmul.f32 %v1561_v56, %v1561_v56 }
 0x295   :  { %v1624_v0 = vmul.f32 %v1560_v60, %v1560_v60  ;;  %v2341_v1 = vpop.f32.mrb[32].mxu1 }
 0x296   :  { %v1722_v2 = vadd.f32 %v1721_v62, %v1720_v61  ;;  %1499 = vst.msk [vmem:[%s3599_s4 + $0x138] sm:$0xff] %vm105_vm0, %v2341_v1  ;;  %v1563_v4 = vsub.f32 %v2341_v1, %v2474_v3  ;;  %v1331_v5 = vpop.f32.mrb[33].mxu1  ;;  %v1725_v10 = vsel %vm105_vm0, %v1625_v63, 0.0  ;;  %v2484_v63 = vld [vmem:[%s3595_s0 + $0x188] sm:$0xff]  ;;  %v2485_v3 = vld [vmem:[%s3595_s0 + $0x180] sm:$0xff] }
 0x297   :  { %v1723_v6 = vsel %vm105_vm0, %v1624_v0, 0.0  ;;  %1498 = vst.msk [vmem:[%s3599_s4 + $0x130] sm:$0xff] %vm105_vm0, %v1331_v5  ;;  %v1562_v8 = vsub.f32 %v1331_v5, %v2475_v7 }
 0x298   :  { %v1724_v9 = vadd.f32 %v1723_v6, %v1722_v2  ;;  %v1627_v11 = vmul.f32 %v1563_v4, %v1563_v4 }
 0x299   :  { %v1626_v12 = vmul.f32 %v1562_v8, %v1562_v8  ;;  %v2344_v13 = vpop.f32.mrb[34].mxu1 }
 0x29a   :  { %v1726_v14 = vadd.f32 %v1725_v10, %v1724_v9  ;;  %1501 = vst.msk [vmem:[%s3599_s4 + $0x148] sm:$0xff] %vm105_vm0, %v2344_v13  ;;  %v1565_v16 = vsub.f32 %v2344_v13, %v2476_v15  ;;  %v1341_v17 = vpop.f32.mrb[35].mxu1  ;;  %v1729_v22 = vsel %vm105_vm0, %v1627_v11, 0.0  ;;  %v2486_v11 = vld [vmem:[%s3595_s0 + $0x198] sm:$0xff]  ;;  %v2487_v15 = vld [vmem:[%s3595_s0 + $0x190] sm:$0xff] }
 0x29b   :  { %v1727_v18 = vsel %vm105_vm0, %v1626_v12, 0.0  ;;  %1500 = vst.msk [vmem:[%s3599_s4 + $0x140] sm:$0xff] %vm105_vm0, %v1341_v17  ;;  %v1564_v20 = vsub.f32 %v1341_v17, %v2477_v19 }
 0x29c   :  { %v1728_v21 = vadd.f32 %v1727_v18, %v1726_v14  ;;  %v1629_v23 = vmul.f32 %v1565_v16, %v1565_v16 }
 0x29d   :  { %v1628_v24 = vmul.f32 %v1564_v20, %v1564_v20  ;;  %v2347_v25 = vpop.f32.mrb[36].mxu1 }
 0x29e   :  { %v1730_v26 = vadd.f32 %v1729_v22, %v1728_v21  ;;  %1503 = vst.msk [vmem:[%s3599_s4 + $0x158] sm:$0xff] %vm105_vm0, %v2347_v25  ;;  %v1567_v29 = vsub.f32 %v2347_v25, %v2478_v28  ;;  %v1351_v30 = vpop.f32.mrb[37].mxu1  ;;  %v1733_v37 = vsel %vm105_vm0, %v1629_v23, 0.0  ;;  %v2488_v23 = vld [vmem:[%s3595_s0 + $0x1a8] sm:$0xff]  ;;  %v2489_v28 = vld [vmem:[%s3595_s0 + $0x1a0] sm:$0xff] }
 0x29f   :  { %v1731_v31 = vsel %vm105_vm0, %v1628_v24, 0.0  ;;  %1502 = vst.msk [vmem:[%s3599_s4 + $0x150] sm:$0xff] %vm105_vm0, %v1351_v30  ;;  %v1566_v33 = vsub.f32 %v1351_v30, %v2479_v32 }
 0x2a0   :  { %v1732_v35 = vadd.f32 %v1731_v31, %v1730_v26  ;;  %v1631_v38 = vmul.f32 %v1567_v29, %v1567_v29 }
 0x2a1   :  { %v1630_v27 = vmul.f32 %v1566_v33, %v1566_v33  ;;  %v2350_v39 = vpop.f32.mrb[38].mxu1 }
 0x2a2   :  { %v1734_v40 = vadd.f32 %v1733_v37, %v1732_v35  ;;  %1505 = vst.msk [vmem:[%s3599_s4 + $0x168] sm:$0xff] %vm105_vm0, %v2350_v39  ;;  %v1569_v36 = vsub.f32 %v2350_v39, %v2480_v34  ;;  %v1361_v41 = vpop.f32.mrb[39].mxu1  ;;  %v1737_v46 = vsel %vm105_vm0, %v1631_v38, 0.0  ;;  %v2490_v38 = vld [vmem:[%s3595_s0 + $0x1b8] sm:$0xff]  ;;  %v2491_v34 = vld [vmem:[%s3595_s0 + $0x1b0] sm:$0xff] }
 0x2a3   :  { %v1735_v42 = vsel %vm105_vm0, %v1630_v27, 0.0  ;;  %1504 = vst.msk [vmem:[%s3599_s4 + $0x160] sm:$0xff] %vm105_vm0, %v1361_v41  ;;  %v1568_v44 = vsub.f32 %v1361_v41, %v2481_v43 }
 0x2a4   :  { %v1736_v45 = vadd.f32 %v1735_v42, %v1734_v40  ;;  %v1633_v47 = vmul.f32 %v1569_v36, %v1569_v36 }
 0x2a5   :  { %v1632_v48 = vmul.f32 %v1568_v44, %v1568_v44  ;;  %v2353_v49 = vpop.f32.mrb[40].mxu1 }
 0x2a6   :  { %v1738_v50 = vadd.f32 %v1737_v46, %v1736_v45  ;;  %1507 = vst.msk [vmem:[%s3599_s4 + $0x178] sm:$0xff] %vm105_vm0, %v2353_v49  ;;  %v1571_v52 = vsub.f32 %v2353_v49, %v2482_v51  ;;  %v1371_v53 = vpop.f32.mrb[41].mxu1  ;;  %v1741_v58 = vsel %vm105_vm0, %v1633_v47, 0.0  ;;  %v2492_v47 = vld [vmem:[%s3595_s0 + $0x1c8] sm:$0xff]  ;;  %v2493_v51 = vld [vmem:[%s3595_s0 + $0x1c0] sm:$0xff] }
 0x2a7   :  { %v1739_v54 = vsel %vm105_vm0, %v1632_v48, 0.0  ;;  %1506 = vst.msk [vmem:[%s3599_s4 + $0x170] sm:$0xff] %vm105_vm0, %v1371_v53  ;;  %v1570_v56 = vsub.f32 %v1371_v53, %v2483_v55 }
 0x2a8   :  { %v1740_v57 = vadd.f32 %v1739_v54, %v1738_v50  ;;  %v1635_v59 = vmul.f32 %v1571_v52, %v1571_v52 }
 0x2a9   :  { %v1634_v60 = vmul.f32 %v1570_v56, %v1570_v56  ;;  %v2356_v61 = vpop.f32.mrb[42].mxu1 }
 0x2aa   :  { %v1742_v62 = vadd.f32 %v1741_v58, %v1740_v57  ;;  %1509 = vst.msk [vmem:[%s3599_s4 + $0x188] sm:$0xff] %vm105_vm0, %v2356_v61  ;;  %v1573_v0 = vsub.f32 %v2356_v61, %v2484_v63  ;;  %v1381_v1 = vpop.f32.mrb[43].mxu1  ;;  %v1745_v6 = vsel %vm105_vm0, %v1635_v59, 0.0  ;;  %v2494_v59 = vld [vmem:[%s3595_s0 + $0x1d8] sm:$0xff]  ;;  %v2495_v63 = vld [vmem:[%s3595_s0 + $0x1d0] sm:$0xff] }
 0x2ab   :  { %v1743_v2 = vsel %vm105_vm0, %v1634_v60, 0.0  ;;  %1508 = vst.msk [vmem:[%s3599_s4 + $0x180] sm:$0xff] %vm105_vm0, %v1381_v1  ;;  %v1572_v4 = vsub.f32 %v1381_v1, %v2485_v3 }
 0x2ac   :  { %v1744_v5 = vadd.f32 %v1743_v2, %v1742_v62  ;;  %v1637_v7 = vmul.f32 %v1573_v0, %v1573_v0 }
 0x2ad   :  { %v1636_v8 = vmul.f32 %v1572_v4, %v1572_v4  ;;  %v2359_v9 = vpop.f32.mrb[44].mxu1 }
 0x2ae   :  { %v1746_v10 = vadd.f32 %v1745_v6, %v1744_v5  ;;  %1511 = vst.msk [vmem:[%s3599_s4 + $0x198] sm:$0xff] %vm105_vm0, %v2359_v9  ;;  %v1575_v12 = vsub.f32 %v2359_v9, %v2486_v11  ;;  %v1391_v13 = vpop.f32.mrb[45].mxu1  ;;  %v1749_v18 = vsel %vm105_vm0, %v1637_v7, 0.0  ;;  %v2496_v7 = vld [vmem:[%s3595_s0 + $0x1e8] sm:$0xff]  ;;  %v2497_v11 = vld [vmem:[%s3595_s0 + $0x1e0] sm:$0xff] }
 0x2af   :  { %v1747_v14 = vsel %vm105_vm0, %v1636_v8, 0.0  ;;  %1510 = vst.msk [vmem:[%s3599_s4 + $0x190] sm:$0xff] %vm105_vm0, %v1391_v13  ;;  %v1574_v16 = vsub.f32 %v1391_v13, %v2487_v15 }
 0x2b0   :  { %v1748_v17 = vadd.f32 %v1747_v14, %v1746_v10  ;;  %v1639_v19 = vmul.f32 %v1575_v12, %v1575_v12 }
 0x2b1   :  { %v1638_v20 = vmul.f32 %v1574_v16, %v1574_v16  ;;  %v2362_v21 = vpop.f32.mrb[46].mxu1 }
 0x2b2   :  { %v1750_v22 = vadd.f32 %v1749_v18, %v1748_v17  ;;  %1513 = vst.msk [vmem:[%s3599_s4 + $0x1a8] sm:$0xff] %vm105_vm0, %v2362_v21  ;;  %v1577_v24 = vsub.f32 %v2362_v21, %v2488_v23  ;;  %v1401_v25 = vpop.f32.mrb[47].mxu1  ;;  %v1753_v31 = vsel %vm105_vm0, %v1639_v19, 0.0  ;;  %v2498_v19 = vld [vmem:[%s3595_s0 + $0x1f8] sm:$0xff]  ;;  %v2499_v23 = vld [vmem:[%s3595_s0 + $0x1f0] sm:$0xff] }
 0x2b3   :  { %v1751_v26 = vsel %vm105_vm0, %v1638_v20, 0.0  ;;  %1512 = vst.msk [vmem:[%s3599_s4 + $0x1a0] sm:$0xff] %vm105_vm0, %v1401_v25  ;;  %v1576_v29 = vsub.f32 %v1401_v25, %v2489_v28 }
 0x2b4   :  { %v1752_v30 = vadd.f32 %v1751_v26, %v1750_v22  ;;  %v1641_v32 = vmul.f32 %v1577_v24, %v1577_v24 }
 0x2b5   :  { %v1640_v33 = vmul.f32 %v1576_v29, %v1576_v29  ;;  %v2365_v35 = vpop.f32.mrb[48].mxu1 }
 0x2b6   :  { %v1754_v37 = vadd.f32 %v1753_v31, %v1752_v30  ;;  %1515 = vst.msk [vmem:[%s3599_s4 + $0x1b8] sm:$0xff] %vm105_vm0, %v2365_v35  ;;  %v1579_v27 = vsub.f32 %v2365_v35, %v2490_v38  ;;  %v1411_v39 = vpop.f32.mrb[49].mxu1  ;;  %v1757_v42 = vsel %vm105_vm0, %v1641_v32, 0.0 }
 0x2b7   :  { %v1755_v40 = vsel %vm105_vm0, %v1640_v33, 0.0  ;;  %1514 = vst.msk [vmem:[%s3599_s4 + $0x1b0] sm:$0xff] %vm105_vm0, %v1411_v39  ;;  %v1578_v36 = vsub.f32 %v1411_v39, %v2491_v34 }
 0x2b8   :  { %v1756_v41 = vadd.f32 %v1755_v40, %v1754_v37  ;;  %v1643_v43 = vmul.f32 %v1579_v27, %v1579_v27 }
 0x2b9   :  { %v1642_v44 = vmul.f32 %v1578_v36, %v1578_v36  ;;  %v2368_v45 = vpop.f32.mrb[50].mxu1 }
 0x2ba   :  { %v1758_v46 = vadd.f32 %v1757_v42, %v1756_v41  ;;  %1517 = vst.msk [vmem:[%s3599_s4 + $0x1c8] sm:$0xff] %vm105_vm0, %v2368_v45  ;;  %v1581_v48 = vsub.f32 %v2368_v45, %v2492_v47  ;;  %v1421_v49 = vpop.f32.mrb[51].mxu1  ;;  %v1761_v54 = vsel %vm105_vm0, %v1643_v43, 0.0 }
 0x2bb   :  { %v1759_v50 = vsel %vm105_vm0, %v1642_v44, 0.0  ;;  %1516 = vst.msk [vmem:[%s3599_s4 + $0x1c0] sm:$0xff] %vm105_vm0, %v1421_v49  ;;  %v1580_v52 = vsub.f32 %v1421_v49, %v2493_v51 }
 0x2bc   :  { %v1760_v53 = vadd.f32 %v1759_v50, %v1758_v46  ;;  %v1645_v55 = vmul.f32 %v1581_v48, %v1581_v48 }
 0x2bd   :  { %v1644_v56 = vmul.f32 %v1580_v52, %v1580_v52  ;;  %v2371_v57 = vpop.f32.mrb[52].mxu1 }
 0x2be   :  { %v1762_v58 = vadd.f32 %v1761_v54, %v1760_v53  ;;  %1519 = vst.msk [vmem:[%s3599_s4 + $0x1d8] sm:$0xff] %vm105_vm0, %v2371_v57  ;;  %v1583_v60 = vsub.f32 %v2371_v57, %v2494_v59  ;;  %v1431_v61 = vpop.f32.mrb[53].mxu1  ;;  %v1765_v2 = vsel %vm105_vm0, %v1645_v55, 0.0 }
 0x2bf   :  { %v1763_v62 = vsel %vm105_vm0, %v1644_v56, 0.0  ;;  %1518 = vst.msk [vmem:[%s3599_s4 + $0x1d0] sm:$0xff] %vm105_vm0, %v1431_v61  ;;  %v1582_v0 = vsub.f32 %v1431_v61, %v2495_v63 }
 0x2c0   :  { %v1764_v1 = vadd.f32 %v1763_v62, %v1762_v58  ;;  %v1647_v3 = vmul.f32 %v1583_v60, %v1583_v60 }
 0x2c1   :  { %v1646_v4 = vmul.f32 %v1582_v0, %v1582_v0  ;;  %v2374_v5 = vpop.f32.mrb[54].mxu1 }
 0x2c2   :  { %v1766_v6 = vadd.f32 %v1765_v2, %v1764_v1  ;;  %1521 = vst.msk [vmem:[%s3599_s4 + $0x1e8] sm:$0xff] %vm105_vm0, %v2374_v5  ;;  %v1585_v8 = vsub.f32 %v2374_v5, %v2496_v7  ;;  %v1441_v9 = vpop.f32.mrb[55].mxu1  ;;  %v1769_v14 = vsel %vm105_vm0, %v1647_v3, 0.0 }
 0x2c3   :  { %v1767_v10 = vsel %vm105_vm0, %v1646_v4, 0.0  ;;  %1520 = vst.msk [vmem:[%s3599_s4 + $0x1e0] sm:$0xff] %vm105_vm0, %v1441_v9  ;;  %v1584_v12 = vsub.f32 %v1441_v9, %v2497_v11 }
 0x2c4   :  { %v1768_v13 = vadd.f32 %v1767_v10, %v1766_v6  ;;  %v1649_v15 = vmul.f32 %v1585_v8, %v1585_v8 }
 0x2c5   :  { %v1648_v16 = vmul.f32 %v1584_v12, %v1584_v12  ;;  %v2377_v17 = vpop.f32.mrb[56].mxu1 }
 0x2c6   :  { %v1770_v18 = vadd.f32 %v1769_v14, %v1768_v13  ;;  %1523 = vst.msk [vmem:[%s3599_s4 + $0x1f8] sm:$0xff] %vm105_vm0, %v2377_v17  ;;  %v1587_v20 = vsub.f32 %v2377_v17, %v2498_v19  ;;  %v1451_v21 = vpop.f32.mrb[57].mxu1  ;;  %v1773_v26 = vsel %vm105_vm0, %v1649_v15, 0.0 }
 0x2c7   :  { %v1771_v22 = vsel %vm105_vm0, %v1648_v16, 0.0  ;;  %1522 = vst.msk [vmem:[%s3599_s4 + $0x1f0] sm:$0xff] %vm105_vm0, %v1451_v21  ;;  %v1586_v24 = vsub.f32 %v1451_v21, %v2499_v23  ;;  %s2525_s4 = smov [#allocation2]  }
 0x2c8   :  { %v1772_v25 = vadd.f32 %v1771_v22, %v1770_v18  ;;  %v1651_v28 = vmul.f32 %v1587_v20, %v1587_v20  ;;  %s1795_s8 = sshll.u32 %s2525_s4, 4  ;;  %s1796_s8 = int_to_ptr.vmem [resolvable:$true] %s1795_s8 }
 0x2c9   :  { %v1650_v29 = vmul.f32 %v1586_v24, %v1586_v24  ;;  %s2500_s0 = scalar_lea.vmem %s1796_s8, 16  ;;  %s2504_s9 = scalar_lea.vmem %s1796_s8, 32 }
 0x2ca   :  { %v1774_v30 = vadd.f32 %v1773_v26, %v1772_v25  ;;  %v1777_v33 = vsel %vm105_vm0, %v1651_v28, 0.0  ;;  %p2501_p0 = scmp.ne.s32.totalorder %s1796_s8, %s2500_s0  ;;  %p2505_p1 = scmp.lt.s32.totalorder %s1796_s8, %s1796_s8 }
 0x2cb   :  { %v1775_v31 = vsel %vm105_vm0, %v1650_v29, 0.0  ;;  %p2506_p2 = scmp.lt.s32.totalorder %s2504_s9, %s2500_s0 }
 0x2cc   :  { %v1776_v32 = vadd.f32 %v1775_v31, %v1774_v30 }
 0x2cd   :  { %p2507_p3 = por %p2506_p2, %p2505_p1 }
 0x2ce   :  { %v1778_v35 = vadd.f32 %v1777_v33, %v1776_v32 }
 0x2cf   :  { %p2508_p4 = pnand %p2507_p3, %p2501_p0 }
 0x2d0   :  { %v1779_v37 = vrot.slane %v1778_v35, 4 }
 0x2d2   :  { %v1780_v38 = vadd.f32 %v1779_v37, %v1778_v35 }
 0x2d4   :  { %v1781_v27 = vrot.slane %v1780_v38, 2 }
 0x2d6   :  { %v1782_v39 = vadd.f32 %v1781_v27, %v1780_v38 }
 0x2d8   :  { %v1783_v40 = vrot.slane %v1782_v39, 1 }
 0x2da   :  { %v1784_v34 = vadd.f32 %v1783_v40, %v1782_v39 }
 0x2dc   :  { %1786 = vst.msk [vmem:[#allocation2] sm:$0x1] %vm1785_vm5, %v1784_v34 }
 0x2dd   :  { %2511 = shalt.err (!%p2508_p4)
}
 0x2de   :  { %s2512_s12 = scalar_lea.hbm %s3600_s5, 16 }
 0x2df   :  { %p2513_p5 = scmp.ne.s32.totalorder %s3600_s5, %s2512_s12  ;;  %p2516_p6 = scmp.lt.u32.totalorder %s2512_s12, %s3600_s5 }
 0x2e1   :  { %p2518_p7 = pnand %p2516_p6, %p2513_p5 }
 0x2e3   :  { %2521 = shalt.err (!%p2518_p7)
}
 0x2e4   :  { %1798 = dma.vmem_to_hbm [thread:$0]  %s1796_s8, 16, %s3600_s5, [#allocation3]  }
 0x2e5   :  { %2522 = dma.done.wait [#allocation3], 16  }
 0x2e6   :  { %2523 = vsyncadd [#allocation3], 4294967280 }
 0x2e7   :  { %1804 = vsyncpa [#allocation3], 1 }

</bundles_post_ra>
